<compile_context>
chip_gen: v7x
topology: tpu7x:2x2x1
jax: 0.10.0
libtpu: 0.0.40
codegen_flags: <defaults>
</compile_context>

<pallas_src>
import math

import jax
import jax.numpy as jnp
import numpy as np
from jax import lax
from jax.experimental import pallas as pl
from jax.experimental.pallas import tpu as pltpu

K = 7
PAD = (K - 1) // 2
BN_EPS = 1e-5


def _build_toeplitz(w, H, W):
    """Fold (kh, kw) taps + H/W zero padding + BN scale + the K depth taps into a single
    merged (K*2*H*W, H*W) block-Toeplitz matrix (contraction index = (kd, c, hw_in))."""
    wgt = np.asarray(w, np.float32)[0]                    # (2, K, K, K): (c, kd, kh, kw)
    m = np.zeros((2, K, H, W, H, W), np.float32)          # [c, kd, hp, wp, h, w]
    for kh in range(K):
        for kw in range(K):
            dh, dw = kh - PAD, kw - PAD
            hs = np.arange(max(0, -dh), min(H, H - dh))   # output rows with valid input
            ws = np.arange(max(0, -dw), min(W, W - dw))
            hh, ww = np.meshgrid(hs, ws, indexing="ij")
            m[:, :, hh + dh, ww + dw, hh, ww] = wgt[:, :, kh, kw][:, :, None, None]
    m = m.reshape(2, K, H * W, H * W)                     # (c, kd, hw_in, hw_out)
    m = np.transpose(m, (1, 0, 2, 3)).reshape(K * 2 * H * W, H * W)
    # Fold eval-mode BatchNorm3d (default stats) scale into the conv weights.
    return m * np.float32(1.0 / math.sqrt(1.0 + BN_EPS))


def spatial_gate_kernel(m_ref, x_ref, o_ref, pad_ref, col_ref):
    N, C, D, HW = x_ref.shape
    x = x_ref[...].astype(jnp.float32)                    # (N, C, D, HW), lane-dense

    # ---- ChannelPool: max / mean over channels (C is an untiled leading dim) ----
    x_max = jnp.max(x, axis=1)                            # (N, D, HW)
    x_mean = jnp.mean(x, axis=1)                          # (N, D, HW)

    # ---- D-padded, channel-concatenated pool in a lane-dense (N, D+2*PAD, 2*HW) buffer.
    # Only the D halo faces need zeroing; the interior is fully overwritten right after.
    # (Zeroed every step on purpose — scratch is per-core, do not gate on program_id.)
    pad_ref[:, 0:PAD, :] = jnp.zeros((N, PAD, 2 * HW), pad_ref.dtype)
    pad_ref[:, PAD + D:D + 2 * PAD, :] = jnp.zeros((N, PAD, 2 * HW), pad_ref.dtype)
    pad_ref[:, PAD:PAD + D, 0:HW] = x_max.astype(pad_ref.dtype)
    pad_ref[:, PAD:PAD + D, HW:2 * HW] = x_mean.astype(pad_ref.dtype)

    # ---- im2col over the K depth taps: (N*D, K*2*HW) bf16, lane-aligned column blocks.
    for n in range(N):
        for kd in range(K):
            col_ref[n * D:(n + 1) * D, kd * 2 * HW:(kd + 1) * 2 * HW] = \
                pad_ref[n, kd:kd + D, :]

    # ---- Conv3d(2->1, k=7, pad=3, no bias) + folded BN as ONE bf16 MXU matmul with
    #      f32 accumulation: (N*D, K*2*HW) @ (K*2*HW, HW) -> (N*D, HW).
    conv_bn = jnp.dot(col_ref[...], m_ref[...], preferred_element_type=jnp.float32)

    # ---- ReLU -> sigmoid -> gate the input (broadcast over channels) ----
    scale = jax.nn.sigmoid(jnp.maximum(conv_bn, 0.0))     # (N*D, HW)
    scale = scale.reshape(N, 1, D, HW)
    o_ref[...] = (x * scale).astype(o_ref.dtype)


def make_spatial_gate(w, H, W):
    """Build the (bf16) merged Toeplitz weights ONCE and return a jitted callable.

    w: (1, 2, 7, 7, 7) Conv3d weight (OIDHW).  Returned fn takes x: (N, C, D, H, W)."""
    HW = H * W
    m = jnp.asarray(_build_toeplitz(w, H, W), jnp.bfloat16)   # (K*2*HW, HW), built once

    @jax.jit
    def spatial_gate(x):
        N, C, D, H_, W_ = x.shape
        assert (H_, W_) == (H, W)
        x2 = x.reshape(N, C, D, HW)                       # wrapper-side lane-dense plumbing

        cost = pl.CostEstimate(
            flops=2 * N * D * (K * 2 * HW) * HW,
            transcendentals=N * D * HW,
            bytes_accessed=m.size * 2 + 2 * x2.size * x2.dtype.itemsize,
        )
        out2 = pl.pallas_call(
            spatial_gate_kernel,
            out_shape=jax.ShapeDtypeStruct((N, C, D, HW), x.dtype),
            grid=(1,),
            in_specs=[
                # Resident merged Toeplitz weights; constant index_map -> single-buffer.
                pl.BlockSpec((K * 2 * HW, HW), lambda i: (0, 0),
                             pipeline_mode=pl.Buffered(1)),
                # Whole batch as one block: N is folded into the matmul M dimension.
                pl.BlockSpec((N, C, D, HW), lambda i: (0, 0, 0, 0)),
            ],
            out_specs=pl.BlockSpec((N, C, D, HW), lambda i: (0, 0, 0, 0)),
            scratch_shapes=[
                pltpu.VMEM((N, D + 2 * PAD, 2 * HW), jnp.bfloat16),   # D-padded pool
                pltpu.VMEM((N * D, K * 2 * HW), jnp.bfloat16),        # im2col LHS
            ],
            compiler_params=pltpu.CompilerParams(
                dimension_semantics=("arbitrary",),
                vmem_limit_bytes=32 * 1024 * 1024,
            ),
            cost_estimate=cost,
        )(m, x2)
        return out2.reshape(N, C, D, H, W)

    return spatial_gate


def spatial_gate_reference(x, w):
    """Pure-JAX reference matching the PyTorch forward semantics."""
    x_max = jnp.max(x, axis=1, keepdims=True)
    x_mean = jnp.mean(x, axis=1, keepdims=True)
    xc = jnp.concatenate([x_max, x_mean], axis=1)          # (N, 2, D, H, W)
    conv = lax.conv_general_dilated(
        xc, w, window_strides=(1, 1, 1), padding=[(PAD, PAD)] * 3,
        dimension_numbers=("NCDHW", "OIDHW", "NCDHW"),
        precision=lax.Precision.HIGHEST)
    bn = conv * (1.0 / jnp.sqrt(1.0 + BN_EPS))
    scale = jax.nn.sigmoid(jnp.maximum(bn, 0.0))
    return x * scale


if __name__ == "__main__":
    key = jax.random.PRNGKey(0)
    kx, kw = jax.random.split(key)

    N, C, D, H, W = 2, 4, 8, 16, 16
    x = jax.random.normal(kx, (N, C, D, H, W), dtype=jnp.float32)

    # Deterministic synthetic Conv3d(2, 1, 7) weight, Kaiming-like scaling.
    fan_in = 2 * K * K * K
    w = jax.random.normal(kw, (1, 2, K, K, K), dtype=jnp.float32) / jnp.sqrt(float(fan_in))

    spatial_gate = make_spatial_gate(w, H, W)              # weights built/uploaded once
    out = jax.block_until_ready(spatial_gate(x))
    ref = spatial_gate_reference(x, w)

    assert out.shape == x.shape and out.dtype == x.dtype
    # Tolerance accounts for the bf16 weight/LHS cast (f32 accumulation on the MXU).
    np.testing.assert_allclose(np.asarray(out), np.asarray(ref), rtol=1e-2, atol=1e-2)
    print("KERNEL_OK")
</pallas_src>

<mosaic_0001>
module attributes {stable_mosaic.version = 11 : i64} {
  func.func @spatial_gate_kernel(%arg0: i32, %arg1: memref<3584x256xbf16, #tpu.memory_space<vmem>>, %arg2: memref<2x4x8x256xf32, #tpu.memory_space<vmem>>, %arg3: memref<2x4x8x256xf32, #tpu.memory_space<vmem>>, %arg4: memref<2x14x512xbf16, #tpu.memory_space<vmem>>, %arg5: memref<16x3584xbf16, #tpu.memory_space<vmem>>) attributes {dimension_semantics = [#tpu.dimension_semantics<arbitrary>], iteration_bounds = array<i64: 1>, scalar_prefetch = 0 : i64, scratch_operands = 2 : i64, tpu.core_type = #tpu.core_type<tc>, window_params = [{pipeline_mode = #tpu.pipeline_mode<synchronous>, transform_indices = @transform_0, window_bounds = array<i64: 3584, 256>}, {pipeline_mode = #tpu.pipeline_mode<synchronous>, transform_indices = @transform_1, window_bounds = array<i64: 2, 4, 8, 256>}, {pipeline_mode = #tpu.pipeline_mode<synchronous>, transform_indices = @transform_2, window_bounds = array<i64: 2, 4, 8, 256>}]} {
    %c0 = arith.constant 0 : index
    %c0_0 = arith.constant 0 : index
    %c0_1 = arith.constant 0 : index
    %c0_2 = arith.constant 0 : index
    %0 = vector.load %arg2[%c0, %c0_0, %c0_1, %c0_2] : memref<2x4x8x256xf32, #tpu.memory_space<vmem>>, vector<2x4x8x256xf32>
    %cst = arith.constant dense<0xFF800000> : vector<2x8x256xf32>
    %1 = vector.multi_reduction <maximumf>, %0, %cst [1] : vector<2x4x8x256xf32> to vector<2x8x256xf32>
    %cst_3 = arith.constant dense<0.000000e+00> : vector<2x8x256xf32>
    %2 = vector.multi_reduction <add>, %0, %cst_3 [1] : vector<2x4x8x256xf32> to vector<2x8x256xf32>
    %cst_4 = arith.constant 4.000000e+00 : f32
    %3 = vector.broadcast %cst_4 : f32 to vector<2x8x256xf32>
    %4 = arith.divf %2, %3 : vector<2x8x256xf32>
    %cst_5 = arith.constant 0.000000e+00 : bf16
    %5 = vector.broadcast %cst_5 : bf16 to vector<2x3x512xbf16>
    %c0_6 = arith.constant 0 : index
    %c0_7 = arith.constant 0 : index
    %c0_8 = arith.constant 0 : index
    %6 = vector.load %arg4[%c0_6, %c0_7, %c0_8] : memref<2x14x512xbf16, #tpu.memory_space<vmem>>, vector<2x3x512xbf16>
    tpu.vector_store %arg4[%c0_6, %c0_7, %c0_8], %5 {strides = array<i32>} : memref<2x14x512xbf16, #tpu.memory_space<vmem>>, vector<2x3x512xbf16>,
    %cst_9 = arith.constant 0.000000e+00 : bf16
    %7 = vector.broadcast %cst_9 : bf16 to vector<2x3x512xbf16>
    %c0_10 = arith.constant 0 : index
    %c11 = arith.constant 11 : index
    %c0_11 = arith.constant 0 : index
    %8 = vector.load %arg4[%c0_10, %c11, %c0_11] : memref<2x14x512xbf16, #tpu.memory_space<vmem>>, vector<2x3x512xbf16>
    tpu.vector_store %arg4[%c0_10, %c11, %c0_11], %7 {strides = array<i32>} : memref<2x14x512xbf16, #tpu.memory_space<vmem>>, vector<2x3x512xbf16>,
    %9 = arith.truncf %1 : vector<2x8x256xf32> to vector<2x8x256xbf16>
    %c0_12 = arith.constant 0 : index
    %c3 = arith.constant 3 : index
    %c0_13 = arith.constant 0 : index
    %10 = vector.load %arg4[%c0_12, %c3, %c0_13] : memref<2x14x512xbf16, #tpu.memory_space<vmem>>, vector<2x8x256xbf16>
    tpu.vector_store %arg4[%c0_12, %c3, %c0_13], %9 {strides = array<i32>} : memref<2x14x512xbf16, #tpu.memory_space<vmem>>, vector<2x8x256xbf16>,
    %11 = arith.truncf %4 : vector<2x8x256xf32> to vector<2x8x256xbf16>
    %c0_14 = arith.constant 0 : index
    %c3_15 = arith.constant 3 : index
    %c256 = arith.constant 256 : index
    %12 = vector.load %arg4[%c0_14, %c3_15, %c256] : memref<2x14x512xbf16, #tpu.memory_space<vmem>>, vector<2x8x256xbf16>
    tpu.vector_store %arg4[%c0_14, %c3_15, %c256], %11 {strides = array<i32>} : memref<2x14x512xbf16, #tpu.memory_space<vmem>>, vector<2x8x256xbf16>,
    %c0_16 = arith.constant 0 : index
    %c0_17 = arith.constant 0 : index
    %c0_18 = arith.constant 0 : index
    %13 = vector.load %arg4[%c0_16, %c0_17, %c0_18] : memref<2x14x512xbf16, #tpu.memory_space<vmem>>, vector<1x8x512xbf16>
    %14 = vector.shape_cast %13 : vector<1x8x512xbf16> to vector<8x512xbf16>
    %c0_19 = arith.constant 0 : index
    %c0_20 = arith.constant 0 : index
    %15 = vector.load %arg5[%c0_19, %c0_20] : memref<16x3584xbf16, #tpu.memory_space<vmem>>, vector<8x512xbf16>
    tpu.vector_store %arg5[%c0_19, %c0_20], %14 {strides = array<i32>} : memref<16x3584xbf16, #tpu.memory_space<vmem>>, vector<8x512xbf16>,
    %c0_21 = arith.constant 0 : index
    %c1 = arith.constant 1 : index
    %c0_22 = arith.constant 0 : index
    %16 = vector.load %arg4[%c0_21, %c1, %c0_22] : memref<2x14x512xbf16, #tpu.memory_space<vmem>>, vector<1x8x512xbf16>
    %17 = vector.shape_cast %16 : vector<1x8x512xbf16> to vector<8x512xbf16>
    %c0_23 = arith.constant 0 : index
    %c512 = arith.constant 512 : index
    %18 = vector.load %arg5[%c0_23, %c512] : memref<16x3584xbf16, #tpu.memory_space<vmem>>, vector<8x512xbf16>
    tpu.vector_store %arg5[%c0_23, %c512], %17 {strides = array<i32>} : memref<16x3584xbf16, #tpu.memory_space<vmem>>, vector<8x512xbf16>,
    %c0_24 = arith.constant 0 : index
    %c2 = arith.constant 2 : index
    %c0_25 = arith.constant 0 : index
    %19 = vector.load %arg4[%c0_24, %c2, %c0_25] : memref<2x14x512xbf16, #tpu.memory_space<vmem>>, vector<1x8x512xbf16>
    %20 = vector.shape_cast %19 : vector<1x8x512xbf16> to vector<8x512xbf16>
    %c0_26 = arith.constant 0 : index
    %c1024 = arith.constant 1024 : index
    %21 = vector.load %arg5[%c0_26, %c1024] : memref<16x3584xbf16, #tpu.memory_space<vmem>>, vector<8x512xbf16>
    tpu.vector_store %arg5[%c0_26, %c1024], %20 {strides = array<i32>} : memref<16x3584xbf16, #tpu.memory_space<vmem>>, vector<8x512xbf16>,
    %c0_27 = arith.constant 0 : index
    %c3_28 = arith.constant 3 : index
    %c0_29 = arith.constant 0 : index
    %22 = vector.load %arg4[%c0_27, %c3_28, %c0_29] : memref<2x14x512xbf16, #tpu.memory_space<vmem>>, vector<1x8x512xbf16>
    %23 = vector.shape_cast %22 : vector<1x8x512xbf16> to vector<8x512xbf16>
    %c0_30 = arith.constant 0 : index
    %c1536 = arith.constant 1536 : index
    %24 = vector.load %arg5[%c0_30, %c1536] : memref<16x3584xbf16, #tpu.memory_space<vmem>>, vector<8x512xbf16>
    tpu.vector_store %arg5[%c0_30, %c1536], %23 {strides = array<i32>} : memref<16x3584xbf16, #tpu.memory_space<vmem>>, vector<8x512xbf16>,
    %c0_31 = arith.constant 0 : index
    %c4 = arith.constant 4 : index
    %c0_32 = arith.constant 0 : index
    %25 = vector.load %arg4[%c0_31, %c4, %c0_32] : memref<2x14x512xbf16, #tpu.memory_space<vmem>>, vector<1x8x512xbf16>
    %26 = vector.shape_cast %25 : vector<1x8x512xbf16> to vector<8x512xbf16>
    %c0_33 = arith.constant 0 : index
    %c2048 = arith.constant 2048 : index
    %27 = vector.load %arg5[%c0_33, %c2048] : memref<16x3584xbf16, #tpu.memory_space<vmem>>, vector<8x512xbf16>
    tpu.vector_store %arg5[%c0_33, %c2048], %26 {strides = array<i32>} : memref<16x3584xbf16, #tpu.memory_space<vmem>>, vector<8x512xbf16>,
    %c0_34 = arith.constant 0 : index
    %c5 = arith.constant 5 : index
    %c0_35 = arith.constant 0 : index
    %28 = vector.load %arg4[%c0_34, %c5, %c0_35] : memref<2x14x512xbf16, #tpu.memory_space<vmem>>, vector<1x8x512xbf16>
    %29 = vector.shape_cast %28 : vector<1x8x512xbf16> to vector<8x512xbf16>
    %c0_36 = arith.constant 0 : index
    %c2560 = arith.constant 2560 : index
    %30 = vector.load %arg5[%c0_36, %c2560] : memref<16x3584xbf16, #tpu.memory_space<vmem>>, vector<8x512xbf16>
    tpu.vector_store %arg5[%c0_36, %c2560], %29 {strides = array<i32>} : memref<16x3584xbf16, #tpu.memory_space<vmem>>, vector<8x512xbf16>,
    %c0_37 = arith.constant 0 : index
    %c6 = arith.constant 6 : index
    %c0_38 = arith.constant 0 : index
    %31 = vector.load %arg4[%c0_37, %c6, %c0_38] : memref<2x14x512xbf16, #tpu.memory_space<vmem>>, vector<1x8x512xbf16>
    %32 = vector.shape_cast %31 : vector<1x8x512xbf16> to vector<8x512xbf16>
    %c0_39 = arith.constant 0 : index
    %c3072 = arith.constant 3072 : index
    %33 = vector.load %arg5[%c0_39, %c3072] : memref<16x3584xbf16, #tpu.memory_space<vmem>>, vector<8x512xbf16>
    tpu.vector_store %arg5[%c0_39, %c3072], %32 {strides = array<i32>} : memref<16x3584xbf16, #tpu.memory_space<vmem>>, vector<8x512xbf16>,
    %c1_40 = arith.constant 1 : index
    %c0_41 = arith.constant 0 : index
    %c0_42 = arith.constant 0 : index
    %34 = vector.load %arg4[%c1_40, %c0_41, %c0_42] : memref<2x14x512xbf16, #tpu.memory_space<vmem>>, vector<1x8x512xbf16>
    %35 = vector.shape_cast %34 : vector<1x8x512xbf16> to vector<8x512xbf16>
    %c8 = arith.constant 8 : index
    %c0_43 = arith.constant 0 : index
    %36 = vector.load %arg5[%c8, %c0_43] : memref<16x3584xbf16, #tpu.memory_space<vmem>>, vector<8x512xbf16>
    tpu.vector_store %arg5[%c8, %c0_43], %35 {strides = array<i32>} : memref<16x3584xbf16, #tpu.memory_space<vmem>>, vector<8x512xbf16>,
    %c1_44 = arith.constant 1 : index
    %c1_45 = arith.constant 1 : index
    %c0_46 = arith.constant 0 : index
    %37 = vector.load %arg4[%c1_44, %c1_45, %c0_46] : memref<2x14x512xbf16, #tpu.memory_space<vmem>>, vector<1x8x512xbf16>
    %38 = vector.shape_cast %37 : vector<1x8x512xbf16> to vector<8x512xbf16>
    %c8_47 = arith.constant 8 : index
    %c512_48 = arith.constant 512 : index
    %39 = vector.load %arg5[%c8_47, %c512_48] : memref<16x3584xbf16, #tpu.memory_space<vmem>>, vector<8x512xbf16>
    tpu.vector_store %arg5[%c8_47, %c512_48], %38 {strides = array<i32>} : memref<16x3584xbf16, #tpu.memory_space<vmem>>, vector<8x512xbf16>,
    %c1_49 = arith.constant 1 : index
    %c2_50 = arith.constant 2 : index
    %c0_51 = arith.constant 0 : index
    %40 = vector.load %arg4[%c1_49, %c2_50, %c0_51] : memref<2x14x512xbf16, #tpu.memory_space<vmem>>, vector<1x8x512xbf16>
    %41 = vector.shape_cast %40 : vector<1x8x512xbf16> to vector<8x512xbf16>
    %c8_52 = arith.constant 8 : index
    %c1024_53 = arith.constant 1024 : index
    %42 = vector.load %arg5[%c8_52, %c1024_53] : memref<16x3584xbf16, #tpu.memory_space<vmem>>, vector<8x512xbf16>
    tpu.vector_store %arg5[%c8_52, %c1024_53], %41 {strides = array<i32>} : memref<16x3584xbf16, #tpu.memory_space<vmem>>, vector<8x512xbf16>,
    %c1_54 = arith.constant 1 : index
    %c3_55 = arith.constant 3 : index
    %c0_56 = arith.constant 0 : index
    %43 = vector.load %arg4[%c1_54, %c3_55, %c0_56] : memref<2x14x512xbf16, #tpu.memory_space<vmem>>, vector<1x8x512xbf16>
    %44 = vector.shape_cast %43 : vector<1x8x512xbf16> to vector<8x512xbf16>
    %c8_57 = arith.constant 8 : index
    %c1536_58 = arith.constant 1536 : index
    %45 = vector.load %arg5[%c8_57, %c1536_58] : memref<16x3584xbf16, #tpu.memory_space<vmem>>, vector<8x512xbf16>
    tpu.vector_store %arg5[%c8_57, %c1536_58], %44 {strides = array<i32>} : memref<16x3584xbf16, #tpu.memory_space<vmem>>, vector<8x512xbf16>,
    %c1_59 = arith.constant 1 : index
    %c4_60 = arith.constant 4 : index
    %c0_61 = arith.constant 0 : index
    %46 = vector.load %arg4[%c1_59, %c4_60, %c0_61] : memref<2x14x512xbf16, #tpu.memory_space<vmem>>, vector<1x8x512xbf16>
    %47 = vector.shape_cast %46 : vector<1x8x512xbf16> to vector<8x512xbf16>
    %c8_62 = arith.constant 8 : index
    %c2048_63 = arith.constant 2048 : index
    %48 = vector.load %arg5[%c8_62, %c2048_63] : memref<16x3584xbf16, #tpu.memory_space<vmem>>, vector<8x512xbf16>
    tpu.vector_store %arg5[%c8_62, %c2048_63], %47 {strides = array<i32>} : memref<16x3584xbf16, #tpu.memory_space<vmem>>, vector<8x512xbf16>,
    %c1_64 = arith.constant 1 : index
    %c5_65 = arith.constant 5 : index
    %c0_66 = arith.constant 0 : index
    %49 = vector.load %arg4[%c1_64, %c5_65, %c0_66] : memref<2x14x512xbf16, #tpu.memory_space<vmem>>, vector<1x8x512xbf16>
    %50 = vector.shape_cast %49 : vector<1x8x512xbf16> to vector<8x512xbf16>
    %c8_67 = arith.constant 8 : index
    %c2560_68 = arith.constant 2560 : index
    %51 = vector.load %arg5[%c8_67, %c2560_68] : memref<16x3584xbf16, #tpu.memory_space<vmem>>, vector<8x512xbf16>
    tpu.vector_store %arg5[%c8_67, %c2560_68], %50 {strides = array<i32>} : memref<16x3584xbf16, #tpu.memory_space<vmem>>, vector<8x512xbf16>,
    %c1_69 = arith.constant 1 : index
    %c6_70 = arith.constant 6 : index
    %c0_71 = arith.constant 0 : index
    %52 = vector.load %arg4[%c1_69, %c6_70, %c0_71] : memref<2x14x512xbf16, #tpu.memory_space<vmem>>, vector<1x8x512xbf16>
    %53 = vector.shape_cast %52 : vector<1x8x512xbf16> to vector<8x512xbf16>
    %c8_72 = arith.constant 8 : index
    %c3072_73 = arith.constant 3072 : index
    %54 = vector.load %arg5[%c8_72, %c3072_73] : memref<16x3584xbf16, #tpu.memory_space<vmem>>, vector<8x512xbf16>
    tpu.vector_store %arg5[%c8_72, %c3072_73], %53 {strides = array<i32>} : memref<16x3584xbf16, #tpu.memory_space<vmem>>, vector<8x512xbf16>,
    %c0_74 = arith.constant 0 : index
    %c0_75 = arith.constant 0 : index
    %55 = vector.load %arg5[%c0_74, %c0_75] : memref<16x3584xbf16, #tpu.memory_space<vmem>>, vector<16x3584xbf16>
    %c0_76 = arith.constant 0 : index
    %c0_77 = arith.constant 0 : index
    %56 = vector.load %arg1[%c0_76, %c0_77] : memref<3584x256xbf16, #tpu.memory_space<vmem>>, vector<3584x256xbf16>
    %cst_78 = arith.constant dense<0.000000e+00> : vector<16x256xf32>
    %57 = tpu.matmul %55, %56, %cst_78 {dimension_numbers = #tpu.dot_dimension_numbers<[1], [0], [0], [1], [0, 0, 1, 1], [], []>} : vector<16x3584xbf16>, vector<3584x256xbf16>, vector<16x256xf32> -> vector<16x256xf32>
    %cst_79 = arith.constant 0.000000e+00 : f32
    %58 = vector.broadcast %cst_79 : f32 to vector<16x256xf32>
    %59 = arith.maximumf %57, %58 : vector<16x256xf32>
    %60 = arith.negf %59 : vector<16x256xf32>
    %61 = math.exp %60 : vector<16x256xf32>
    %cst_80 = arith.constant 1.000000e+00 : f32
    %62 = vector.broadcast %cst_80 : f32 to vector<16x256xf32>
    %63 = arith.addf %62, %61 : vector<16x256xf32>
    %64 = arith.divf %62, %63 : vector<16x256xf32>
    %65 = vector.shape_cast %64 : vector<16x256xf32> to vector<2x1x8x256xf32>
    %66 = vector.broadcast %65 : vector<2x1x8x256xf32> to vector<2x4x8x256xf32>
    %67 = arith.mulf %0, %66 : vector<2x4x8x256xf32>
    %c0_81 = arith.constant 0 : index
    %c0_82 = arith.constant 0 : index
    %c0_83 = arith.constant 0 : index
    %c0_84 = arith.constant 0 : index
    %68 = vector.load %arg3[%c0_81, %c0_82, %c0_83, %c0_84] : memref<2x4x8x256xf32, #tpu.memory_space<vmem>>, vector<2x4x8x256xf32>
    tpu.vector_store %arg3[%c0_81, %c0_82, %c0_83, %c0_84], %67 {strides = array<i32>} : memref<2x4x8x256xf32, #tpu.memory_space<vmem>>, vector<2x4x8x256xf32>,
    return
  }
  func.func @transform_0(%arg0: i32) -> (i32, i32) {
    %c0_i32 = arith.constant 0 : i32
    %c0_i32_0 = arith.constant 0 : i32
    %c0_i32_1 = arith.constant 0 : i32
    return %c0_i32, %c0_i32_0 : i32, i32
  }
  func.func @transform_1(%arg0: i32) -> (i32, i32, i32, i32) {
    %c0_i32 = arith.constant 0 : i32
    %c0_i32_0 = arith.constant 0 : i32
    %c0_i32_1 = arith.constant 0 : i32
    %c0_i32_2 = arith.constant 0 : i32
    %c0_i32_3 = arith.constant 0 : i32
    return %c0_i32, %c0_i32_0, %c0_i32_1, %c0_i32_2 : i32, i32, i32, i32
  }
  func.func @transform_2(%arg0: i32) -> (i32, i32, i32, i32) {
    %c0_i32 = arith.constant 0 : i32
    %c0_i32_0 = arith.constant 0 : i32
    %c0_i32_1 = arith.constant 0 : i32
    %c0_i32_2 = arith.constant 0 : i32
    %c0_i32_3 = arith.constant 0 : i32
    return %c0_i32, %c0_i32_0, %c0_i32_1, %c0_i32_2 : i32, i32, i32, i32
  }
}

</mosaic_0001>

<bundles_post_ra>
// kernel: spatial_gate.1
= control target key start
LH: loop header
LB: loop body
LE: loop exit
PB: predicated region body
PF: predicated region fallthrough
CT: control target
= control target key end

     0   :  { %vm58_vm0 = vsmask.f32 1280  ;;  %vm57_vm1 = vcmask 1041408   ;;  %vm60_vm2 = vcmask 1045508   ;;  %vm61_vm3 = vsmask.f32 5376  ;;  %s7124_s0 = inlined_call_operand.vmem [shape: bf16[3584,256], index: 0, kind: input, shape index: {}]   ;;  %s7125_s1 = inlined_call_operand.vmem [shape: f32[2,4,8,256], index: 1, kind: input, shape index: {}]   ;;  %s7126_s2 = inlined_call_operand.vmem [shape: f32[2,4,8,256], index: 2, kind: output, shape index: {}]  }
   0x1   :  { %v4735_v0 = vld [vmem:[%s7124_s0 + $0x4] ss:$8 sps:$4 sm:$0xff]   ;;  %v4739_v2 = vld [vmem:[%s7124_s0] ss:$8 sps:$4 sm:$0xff]   ;;  %v4741_v4 = vld [vmem:[%s7124_s0 + $0x14] ss:$8 sps:$4 sm:$0xff]  }
   0x2   :  { %v4737_v1 = vld [vmem:[%s7124_s0 + $0x704] ss:$8 sps:$4 sm:$0xff]   ;;  %3501 = vmatprep.subr.bf16.mxu1 %v4735_v0  ;;  %v4740_v3 = vld [vmem:[%s7124_s0 + $0x700] ss:$8 sps:$4 sm:$0xff]   ;;  %v4743_v5 = vld [vmem:[%s7124_s0 + $0x714] ss:$8 sps:$4 sm:$0xff]  }
   0x3   :  { %3802 = vmatprep.subr.bf16.mxu0 %v4737_v1  ;;  %3502 = vmatpush1.bf16.msra.mxu1 %v4739_v2  ;;  %v4745_v6 = vld [vmem:[%s7124_s0 + $0x10] ss:$8 sps:$4 sm:$0xff]   ;;  %v4747_v8 = vld [vmem:[%s7124_s0 + $0x24] ss:$8 sps:$4 sm:$0xff]   ;;  %v4751_v10 = vld [vmem:[%s7124_s0 + $0x20] ss:$8 sps:$4 sm:$0xff]  }
   0x4   :  { %3803 = vmatpush1.bf16.msra.mxu0 %v4740_v3  ;;  %3503 = vmatprep.subr.bf16.mxu1 %v4741_v4  ;;  %v4746_v7 = vld [vmem:[%s7124_s0 + $0x710] ss:$8 sps:$4 sm:$0xff]   ;;  %v4749_v9 = vld [vmem:[%s7124_s0 + $0x724] ss:$8 sps:$4 sm:$0xff]   ;;  %v4752_v11 = vld [vmem:[%s7124_s0 + $0x720] ss:$8 sps:$4 sm:$0xff]  }
   0x5   :  { %3804 = vmatprep.subr.bf16.mxu0 %v4743_v5  ;;  %v4753_v12 = vld [vmem:[%s7124_s0 + $0x34] ss:$8 sps:$4 sm:$0xff]   ;;  %v4757_v14 = vld [vmem:[%s7124_s0 + $0x30] ss:$8 sps:$4 sm:$0xff]   ;;  %v4759_v16 = vld [vmem:[%s7124_s0 + $0x44] ss:$8 sps:$4 sm:$0xff]  }
   0x6   :  { %v4755_v13 = vld [vmem:[%s7124_s0 + $0x734] ss:$8 sps:$4 sm:$0xff]   ;;  %v4758_v15 = vld [vmem:[%s7124_s0 + $0x730] ss:$8 sps:$4 sm:$0xff]   ;;  %v4761_v17 = vld [vmem:[%s7124_s0 + $0x744] ss:$8 sps:$4 sm:$0xff]  }
   0x7   :  { %3504 = vmatpush1.bf16.msra.mxu1 %v4745_v6  ;;  %v4763_v18 = vld [vmem:[%s7124_s0 + $0x40] ss:$8 sps:$4 sm:$0xff]   ;;  %v4765_v20 = vld [vmem:[%s7124_s0 + $0x54] ss:$8 sps:$4 sm:$0xff]   ;;  %v4769_v22 = vld [vmem:[%s7124_s0 + $0x50] ss:$8 sps:$4 sm:$0xff]  }
   0x8   :  { %3805 = vmatpush1.bf16.msra.mxu0 %v4746_v7  ;;  %3505 = vmatprep.subr.bf16.mxu1 %v4747_v8  ;;  %v4764_v19 = vld [vmem:[%s7124_s0 + $0x740] ss:$8 sps:$4 sm:$0xff]   ;;  %v4767_v21 = vld [vmem:[%s7124_s0 + $0x754] ss:$8 sps:$4 sm:$0xff]   ;;  %v4770_v23 = vld [vmem:[%s7124_s0 + $0x750] ss:$8 sps:$4 sm:$0xff]  }
   0x9   :  { %3806 = vmatprep.subr.bf16.mxu0 %v4749_v9  ;;  %v4771_v24 = vld [vmem:[%s7124_s0 + $0x64] ss:$8 sps:$4 sm:$0xff]   ;;  %v4775_v26 = vld [vmem:[%s7124_s0 + $0x60] ss:$8 sps:$4 sm:$0xff]   ;;  %v4777_v28 = vld [vmem:[%s7124_s0 + $0x74] ss:$8 sps:$4 sm:$0xff]  }
   0xa   :  { %v4773_v25 = vld [vmem:[%s7124_s0 + $0x764] ss:$8 sps:$4 sm:$0xff]   ;;  %v4776_v27 = vld [vmem:[%s7124_s0 + $0x760] ss:$8 sps:$4 sm:$0xff]   ;;  %v4779_v29 = vld [vmem:[%s7124_s0 + $0x774] ss:$8 sps:$4 sm:$0xff]  }
   0xb   :  { %3506 = vmatpush1.bf16.msra.mxu1 %v4751_v10  ;;  %v4781_v30 = vld [vmem:[%s7124_s0 + $0x70] ss:$8 sps:$4 sm:$0xff]   ;;  %v4783_v32 = vld [vmem:[%s7124_s0 + $0x84] ss:$8 sps:$4 sm:$0xff]   ;;  %v4787_v34 = vld [vmem:[%s7124_s0 + $0x80] ss:$8 sps:$4 sm:$0xff]  }
   0xc   :  { %3807 = vmatpush1.bf16.msra.mxu0 %v4752_v11  ;;  %3507 = vmatprep.subr.bf16.mxu1 %v4753_v12  ;;  %v4782_v31 = vld [vmem:[%s7124_s0 + $0x770] ss:$8 sps:$4 sm:$0xff]   ;;  %v4785_v33 = vld [vmem:[%s7124_s0 + $0x784] ss:$8 sps:$4 sm:$0xff]   ;;  %v4788_v35 = vld [vmem:[%s7124_s0 + $0x780] ss:$8 sps:$4 sm:$0xff]  }
   0xd   :  { %3808 = vmatprep.subr.bf16.mxu0 %v4755_v13  ;;  %v4789_v36 = vld [vmem:[%s7124_s0 + $0x94] ss:$8 sps:$4 sm:$0xff]   ;;  %v4793_v38 = vld [vmem:[%s7124_s0 + $0x90] ss:$8 sps:$4 sm:$0xff]   ;;  %v4795_v40 = vld [vmem:[%s7124_s0 + $0xa4] ss:$8 sps:$4 sm:$0xff]  }
   0xe   :  { %v4791_v37 = vld [vmem:[%s7124_s0 + $0x794] ss:$8 sps:$4 sm:$0xff]   ;;  %v4794_v39 = vld [vmem:[%s7124_s0 + $0x790] ss:$8 sps:$4 sm:$0xff]   ;;  %v4797_v41 = vld [vmem:[%s7124_s0 + $0x7a4] ss:$8 sps:$4 sm:$0xff]  }
   0xf   :  { %3508 = vmatpush1.bf16.msra.mxu1 %v4757_v14  ;;  %v4799_v42 = vld [vmem:[%s7124_s0 + $0xa0] ss:$8 sps:$4 sm:$0xff]   ;;  %v4801_v44 = vld [vmem:[%s7124_s0 + $0xb4] ss:$8 sps:$4 sm:$0xff]   ;;  %v4805_v46 = vld [vmem:[%s7124_s0 + $0xb0] ss:$8 sps:$4 sm:$0xff]  }
  0x10   :  { %3809 = vmatpush1.bf16.msra.mxu0 %v4758_v15  ;;  %3509 = vmatprep.subr.bf16.mxu1 %v4759_v16  ;;  %v4800_v43 = vld [vmem:[%s7124_s0 + $0x7a0] ss:$8 sps:$4 sm:$0xff]   ;;  %v4803_v45 = vld [vmem:[%s7124_s0 + $0x7b4] ss:$8 sps:$4 sm:$0xff]   ;;  %v4806_v47 = vld [vmem:[%s7124_s0 + $0x7b0] ss:$8 sps:$4 sm:$0xff]  }
  0x11   :  { %3810 = vmatprep.subr.bf16.mxu0 %v4761_v17  ;;  %v12_v48 = vld [vmem:[%s7125_s1] sm:$0xff]  ;;  %v13_v50 = vld [vmem:[%s7125_s1 + $0x8] sm:$0xff]  ;;  %v14_v51 = vld [vmem:[%s7125_s1 + $0x10] sm:$0xff]  ;;  %vm76_vm4 = vcmask 1042433   ;;  %vm77_vm5 = vsmask.f32 7942 }
  0x12   :  { %v4807_v49 = vld [vmem:[%s7124_s0 + $0xc4] ss:$8 sps:$4 sm:$0xff]   ;;  %v15_v52 = vld [vmem:[%s7125_s1 + $0x18] sm:$0xff]  ;;  %v28_v56 = vmax.f32 %v12_v48, %v14_v51  ;;  %v40_v58 = vadd.f32 %v14_v51, %v12_v48  ;;  %v18_v59 = vld [vmem:[%s7125_s1 + $0x30] sm:$0xff]  ;;  %vm79_vm6 = vcmask 1046533   ;;  %vm131_vm7 = vcmask 1043457  }
  0x13   :  { %3510 = vmatpush1.bf16.msra.mxu1 %v4763_v18  ;;  %v4809_v53 = vld [vmem:[%s7124_s0 + $0x7c4] ss:$8 sps:$4 sm:$0xff]   ;;  %v31_v57 = vmax.f32 %v13_v50, %v15_v52  ;;  %v19_v60 = vld [vmem:[%s7125_s1 + $0x38] sm:$0xff]  ;;  %v43_v62 = vadd.f32 %v15_v52, %v13_v50  ;;  %v4811_v63 = vld [vmem:[%s7124_s0 + $0xc0] ss:$8 sps:$4 sm:$0xff]   ;;  %vm133_vm11 = vcmask 1047557  }
  0x14   :  { %3811 = vmatpush1.bf16.msra.mxu0 %v4764_v19  ;;  %3511 = vmatprep.subr.bf16.mxu1 %v4765_v20  ;;  %v16_v54 = vld [vmem:[%s7125_s1 + $0x20] sm:$0xff]  ;;  %v17_v55 = vld [vmem:[%s7125_s1 + $0x28] sm:$0xff]  ;;  %v22_v2 = vld [vmem:[%s7125_s1 + $0x50] sm:$0xff]  ;;  %vm80_vm9 = vsmask.f32 7958 }
  0x15   :  { %3812 = vmatprep.subr.bf16.mxu0 %v4767_v21  ;;  %v20_v61 = vld [vmem:[%s7125_s1 + $0x40] sm:$0xff]  ;;  %v21_v1 = vld [vmem:[%s7125_s1 + $0x48] sm:$0xff]  ;;  %v23_v3 = vld [vmem:[%s7125_s1 + $0x58] sm:$0xff]  ;;  %v29_v4 = vmax.f32 %v28_v56, %v16_v54  ;;  %v32_v5 = vmax.f32 %v31_v57, %v17_v55  ;;  %v41_v6 = vadd.f32 %v40_v58, %v16_v54  ;;  %v44_v14 = vadd.f32 %v43_v62, %v17_v55 }
  0x16   :  { %v4812_v0 = vld [vmem:[%s7124_s0 + $0x7c0] ss:$8 sps:$4 sm:$0xff]   ;;  %v4813_v7 = vld [vmem:[%s7124_s0 + $0xd4] ss:$8 sps:$4 sm:$0xff]   ;;  %v34_v12 = vmax.f32 %v20_v61, %v22_v2  ;;  %v37_v13 = vmax.f32 %v21_v1, %v23_v3  ;;  %v46_v15 = vadd.f32 %v22_v2, %v20_v61  ;;  %vm5741_vm8 = vmand %vm57_vm1, %vm58_vm0 }
  0x17   :  { %3512 = vmatpush1.bf16.msra.mxu1 %v4769_v22  ;;  %v4815_v8 = vld [vmem:[%s7124_s0 + $0x7d4] ss:$8 sps:$4 sm:$0xff]   ;;  %v24_v9 = vld [vmem:[%s7125_s1 + $0x60] sm:$0xff]  ;;  %v25_v10 = vld [vmem:[%s7125_s1 + $0x68] sm:$0xff]  ;;  %v30_v16 = vmax.f32 %v29_v4, %v18_v59  ;;  %v33_v17 = vmax.f32 %v32_v5, %v19_v60  ;;  %v42_v18 = vadd.f32 %v41_v6, %v18_v59 }
  0x18   :  { %3813 = vmatpush1.bf16.msra.mxu0 %v4770_v23  ;;  %3513 = vmatprep.subr.bf16.mxu1 %v4771_v24  ;;  %v26_v11 = vld [vmem:[%s7125_s1 + $0x70] sm:$0xff]  ;;  %v64_v20 = vld [vmem:[#allocation2] sm:$0x33]  ;;  %v35_v22 = vmax.f32 %v34_v12, %v24_v9  ;;  %v38_v23 = vmax.f32 %v37_v13, %v25_v10  ;;  %v45_v24 = vadd.f32 %v44_v14, %v19_v60  ;;  %vm62_vm10 = vmand %vm60_vm2, %vm61_vm3 }
  0x19   :  { %3814 = vmatprep.subr.bf16.mxu0 %v4773_v25  ;;  %v70_v21 = vld [vmem:[#allocation2 + $0x20] sm:$0x33]  ;;  %v4817_v25 = vld [vmem:[%s7124_s0 + $0xd0] ss:$8 sps:$4 sm:$0xff]   ;;  %vm5758_vm12 = vmor %vm62_vm10, %vm5741_vm8 }
  0x1a   :  { %vm5774_vm13 = vmand %vm76_vm4, %vm77_vm5  ;;  %v54_v50 = vmul.f32 0.25, %v45_v24  ;;  %v4824_v58 = vld [vmem:[%s7124_s0 + $0x7e0] ss:$8 sps:$4 sm:$0xff]   ;;  %v4827_v5 = vld [vmem:[%s7124_s0 + $0x7f4] ss:$8 sps:$4 sm:$0xff]  }
  0x1b   :  { %3514 = vmatpush1.bf16.msra.mxu1 %v4775_v26  ;;  %v4818_v26 = vld [vmem:[%s7124_s0 + $0x7d0] ss:$8 sps:$4 sm:$0xff]   ;;  %vm81_vm14 = vmand %vm79_vm6, %vm80_vm9  ;;  %v4882_v48 = vld [vmem:[%s7124_s0 + $0x864] ss:$8 sps:$4 sm:$0xff]  }
  0x1c   :  { %3815 = vmatpush1.bf16.msra.mxu0 %v4776_v27  ;;  %3515 = vmatprep.subr.bf16.mxu1 %v4777_v28  ;;  %v27_v27 = vld [vmem:[%s7125_s1 + $0x78] sm:$0xff]  ;;  %v47_v28 = vadd.f32 %v46_v15, %v24_v9  ;;  %vm5782_vm15 = vmor %vm81_vm14, %vm5774_vm13 }
  0x1d   :  { %3816 = vmatprep.subr.bf16.mxu0 %v4779_v29  ;;  %v49_v29 = vadd.f32 %v23_v3, %v21_v1  ;;  %vm5798_vm0 = vmand %vm131_vm7, %vm77_vm5  ;;  %v4830_v9 = vld [vmem:[%s7124_s0 + $0x7f0] ss:$8 sps:$4 sm:$0xff]  }
  0x1e   :  { %vm5813_vm1 = vmand %vm133_vm11, %vm80_vm9 }
  0x1f   :  { %3516 = vmatpush1.bf16.msra.mxu1 %v4781_v30  ;;  %vm5832_vm2 = vmor %vm5813_vm1, %vm5798_vm0  ;;  %v4907_v30 = vld [vmem:[%s7124_s0 + $0x1b0] ss:$8 sps:$4 sm:$0xff]  }
  0x20   :  { %3817 = vmatpush1.bf16.msra.mxu0 %v4782_v31  ;;  %3517 = vmatprep.subr.bf16.mxu1 %v4783_v32  ;;  %v4679_v31 = vpack.c.bf16 %v33_v17, %v30_v16  ;;  %v53_v32 = vmul.f32 0.25, %v42_v18  ;;  %v4835_v18 = vld [vmem:[%s7124_s0 + $0x104] ss:$8 sps:$4 sm:$0xff]  }
  0x21   :  { %3818 = vmatprep.subr.bf16.mxu0 %v4785_v33  ;;  %v4819_v33 = vld [vmem:[%s7124_s0 + $0xe4] ss:$8 sps:$4 sm:$0xff]  }
  0x22   :  { %v4681_v4 = vpack.c.bf16 %v54_v50, %v53_v32 }
  0x23   :  { %3518 = vmatpush1.bf16.msra.mxu1 %v4787_v34  ;;  %v4821_v34 = vld [vmem:[%s7124_s0 + $0x7e4] ss:$8 sps:$4 sm:$0xff]  }
  0x24   :  { %3819 = vmatpush1.bf16.msra.mxu0 %v4788_v35  ;;  %3519 = vmatprep.subr.bf16.mxu1 %v4789_v36  ;;  %v36_v35 = vmax.f32 %v35_v22, %v26_v11  ;;  %v39_v36 = vmax.f32 %v38_v23, %v27_v27  ;;  %v166_v12 = vshll.u32 %v4681_v4, 16 }
  0x25   :  { %3820 = vmatprep.subr.bf16.mxu0 %v4791_v37  ;;  %v65_v37 = vsel %vm5758_vm12, 0, %v64_v20 }
  0x26   :  { %66 = vst [vmem:[#allocation2] sm:$0x33] %v65_v37  ;;  %v168_v20 = vrot.slane %v166_v12, 7  ;;  %v4855_v12 = vld [vmem:[%s7124_s0 + $0x124] ss:$8 sps:$4 sm:$0xff]  }
  0x27   :  { %3520 = vmatpush1.bf16.msra.mxu1 %v4793_v38  ;;  %v71_v38 = vsel %vm5758_vm12, 0, %v70_v21 }
  0x28   :  { %3821 = vmatpush1.bf16.msra.mxu0 %v4794_v39  ;;  %3521 = vmatprep.subr.bf16.mxu1 %v4795_v40  ;;  %v67_v40 = vld [vmem:[#allocation2 + $0x8] sm:$0x33]  ;;  %72 = vst [vmem:[#allocation2 + $0x20] sm:$0x33] %v71_v38 }
  0x29   :  { %3822 = vmatprep.subr.bf16.mxu0 %v4797_v41  ;;  %v73_v41 = vld [vmem:[#allocation2 + $0x28] sm:$0x33]  ;;  %v68_v51 = vsel %vm5758_vm12, 0, %v67_v40 }
  0x2a   :  { %v74_v52 = vsel %vm5758_vm12, 0, %v73_v41  ;;  %69 = vst [vmem:[#allocation2 + $0x8] sm:$0x33] %v68_v51 }
  0x2b   :  { %3522 = vmatpush1.bf16.msra.mxu1 %v4799_v42  ;;  %v48_v42 = vadd.f32 %v47_v28, %v26_v11  ;;  %75 = vst [vmem:[#allocation2 + $0x28] sm:$0x33] %v74_v52  ;;  %v163_v11 = vshrl.u32 %v4681_v4, 16 }
  0x2c   :  { %3823 = vmatpush1.bf16.msra.mxu0 %v4800_v43  ;;  %3523 = vmatprep.subr.bf16.mxu1 %v4801_v44  ;;  %v50_v43 = vadd.f32 %v49_v29, %v25_v10  ;;  %v110_v44 = vshrl.u32 %v4679_v31, 16 }
  0x2d   :  { %3824 = vmatprep.subr.bf16.mxu0 %v4803_v45  ;;  %v113_v45 = vshll.u32 %v4679_v31, 16  ;;  %v55_v57 = vmul.f32 0.25, %v48_v42  ;;  %v136_v15 = vld [vmem:[#allocation2] sm:$0xee]  ;;  %v165_v19 = vrot.slane %v163_v11, 6 }
  0x2e   :  { %v51_v54 = vadd.f32 %v50_v43, %v27_v27  ;;  %v112_v55 = vrot.slane %v110_v44, 6 }
  0x2f   :  { %3524 = vmatpush1.bf16.msra.mxu1 %v4805_v46  ;;  %v86_v46 = vld [vmem:[#allocation2 + $0x18] sm:$0x66]  ;;  %v115_v56 = vrot.slane %v113_v45, 7  ;;  %v142_v16 = vld [vmem:[#allocation2 + $0x20] sm:$0xee] }
  0x30   :  { %3825 = vmatpush1.bf16.msra.mxu0 %v4806_v47  ;;  %3525 = vmatprep.subr.bf16.mxu1 %v4807_v49  ;;  %v92_v47 = vld [vmem:[#allocation2 + $0x38] sm:$0x66]  ;;  %v4680_v49 = vpack.c.bf16 %v39_v36, %v36_v35  ;;  %v87_v62 = vsel %vm5782_vm15, 0, %v86_v46  ;;  %v56_v3 = vmul.f32 0.25, %v51_v54 }
  0x31   :  { %3826 = vmatprep.subr.bf16.mxu0 %v4809_v53  ;;  %v4823_v53 = vld [vmem:[%s7124_s0 + $0xe0] ss:$8 sps:$4 sm:$0xff]   ;;  %v5809_v1 = vor.u32 %v115_v56, %v112_v55  ;;  %88 = vst [vmem:[#allocation2 + $0x18] sm:$0x66] %v87_v62  ;;  %v4849_v54 = vld [vmem:[%s7124_s0 + $0x114] ss:$8 sps:$4 sm:$0xff]  }
  0x32   :  { %v119_v59 = vshrl.u32 %v4680_v49, 16  ;;  %v122_v60 = vshll.u32 %v4680_v49, 16  ;;  %v4682_v10 = vpack.c.bf16 %v56_v3, %v55_v57  ;;  %v184_v24 = vld [vmem:[#allocation2 + $0x8] sm:$0xee] }
  0x33   :  { %3526 = vmatpush1.bf16.msra.mxu1 %v4811_v63  ;;  %v93_v63 = vsel %vm5782_vm15, 0, %v92_v47  ;;  %v137_v17 = vsel %vm5832_vm2, %v5809_v1, %v136_v15  ;;  %v4833_v49 = vld [vmem:[%s7124_s0 + $0x100] ss:$8 sps:$4 sm:$0xff]  }
  0x34   :  { %3827 = vmatpush1.bf16.msra.mxu0 %v4812_v0  ;;  %3527 = vmatprep.subr.bf16.mxu1 %v4813_v7  ;;  %v4825_v0 = vld [vmem:[%s7124_s0 + $0xf4] ss:$8 sps:$4 sm:$0xff]   ;;  %94 = vst [vmem:[#allocation2 + $0x38] sm:$0x66] %v93_v63  ;;  %v121_v6 = vrot.slane %v119_v59, 6  ;;  %v124_v7 = vrot.slane %v122_v60, 7 }
  0x35   :  { %3828 = vmatprep.subr.bf16.mxu0 %v4815_v8  ;;  %v4829_v8 = vld [vmem:[%s7124_s0 + $0xf0] ss:$8 sps:$4 sm:$0xff]   ;;  %v172_v21 = vshrl.u32 %v4682_v10, 16  ;;  %138 = vst [vmem:[#allocation2] sm:$0xee] %v137_v17  ;;  %v175_v23 = vshll.u32 %v4682_v10, 16 }
  0x36   :  { %v5826_v13 = vor.u32 %v124_v7, %v121_v6  ;;  %v4847_v10 = vld [vmem:[%s7124_s0 + $0x110] ss:$8 sps:$4 sm:$0xff]   ;;  %v4853_v15 = vld [vmem:[%s7124_s0 + $0x120] ss:$8 sps:$4 sm:$0xff]  }
  0x37   :  { %3528 = vmatpush1.bf16.msra.mxu1 %v4817_v25  ;;  %v4842_v25 = vld [vmem:[%s7124_s0 + $0x804] ss:$8 sps:$4 sm:$0xff]   ;;  %v174_v27 = vrot.slane %v172_v21, 6  ;;  %v177_v28 = vrot.slane %v175_v23, 7  ;;  %v4859_v17 = vld [vmem:[%s7124_s0 + $0x130] ss:$8 sps:$4 sm:$0xff]  }
  0x38   :  { %3829 = vmatpush1.bf16.msra.mxu0 %v4818_v26  ;;  %3529 = vmatprep.subr.bf16.mxu1 %v4819_v33  ;;  %v143_v22 = vsel %vm5832_vm2, %v5826_v13, %v142_v16  ;;  %v169_v26 = vor.u32 %v168_v20, %v165_v19  ;;  %v187_v29 = vld [vmem:[#allocation2 + $0x18] sm:$0x33]  ;;  %v190_v33 = vld [vmem:[#allocation2 + $0x28] sm:$0xee] }
  0x39   :  { %3830 = vmatprep.subr.bf16.mxu0 %v4821_v34  ;;  %144 = vst [vmem:[#allocation2 + $0x20] sm:$0xee] %v143_v22  ;;  %v178_v34 = vor.u32 %v177_v28, %v174_v27  ;;  %v4861_v16 = vld [vmem:[%s7124_s0 + $0x134] ss:$8 sps:$4 sm:$0xff]   ;;  %v4867_v19 = vld [vmem:[%s7124_s0 + $0x144] ss:$8 sps:$4 sm:$0xff]  }
  0x3a   :  { %v170_v31 = vrot.slane %v169_v26, 4  ;;  %v185_v32 = vsel %vm5832_vm2, %v169_v26, %v184_v24  ;;  %v4852_v21 = vld [vmem:[%s7124_s0 + $0x814] ss:$8 sps:$4 sm:$0xff]   ;;  %v4850_v23 = vld [vmem:[%s7124_s0 + $0x810] ss:$8 sps:$4 sm:$0xff]  }
  0x3b   :  { %3530 = vmatpush1.bf16.msra.mxu1 %v4823_v53  ;;  %186 = vst [vmem:[#allocation2 + $0x8] sm:$0xee] %v185_v32  ;;  %v193_v36 = vld [vmem:[#allocation2 + $0x38] sm:$0x33]  ;;  %v179_v37 = vrot.slane %v178_v34, 4  ;;  %v191_v38 = vsel %vm5832_vm2, %v178_v34, %v190_v33 }
  0x3c   :  { %3831 = vmatpush1.bf16.msra.mxu0 %v4824_v58  ;;  %3531 = vmatprep.subr.bf16.mxu1 %v4825_v0  ;;  %v188_v35 = vsel %vm5758_vm12, %v170_v31, %v187_v29  ;;  %v196_v39 = vld [vmem:[#allocation2] sm:$0xff]  ;;  %192 = vst [vmem:[#allocation2 + $0x28] sm:$0xee] %v191_v38  ;;  %v4871_v28 = vld [vmem:[%s7124_s0 + $0x150] ss:$8 sps:$4 sm:$0xff]  }
  0x3d   :  { %3832 = vmatprep.subr.bf16.mxu0 %v4827_v5  ;;  %189 = vst [vmem:[#allocation2 + $0x18] sm:$0x33] %v188_v35  ;;  %v4172_v40 = vcombine.high %v196_v39, %v196_v39  ;;  %v194_v42 = vsel %vm5758_vm12, %v179_v37, %v193_v36  ;;  %v4171_v43 = vcombine.low %v196_v39, %v196_v39  ;;  %v4865_v24 = vld [vmem:[%s7124_s0 + $0x140] ss:$8 sps:$4 sm:$0xff]   ;;  %v4858_v26 = vld [vmem:[%s7124_s0 + $0x824] ss:$8 sps:$4 sm:$0xff]  }
  0x3e   :  { %195 = vst [vmem:[#allocation2 + $0x38] sm:$0x33] %v194_v42  ;;  %v4856_v27 = vld [vmem:[%s7124_s0 + $0x820] ss:$8 sps:$4 sm:$0xff]   ;;  %v4879_v29 = vld [vmem:[%s7124_s0 + $0x164] ss:$8 sps:$4 sm:$0xff]  }
  0x3f   :  { %3532 = vmatpush1.bf16.msra.mxu1 %v4829_v8  ;;  %213 = vst [vmem:[#allocation3 + $0x8] sm:$0xf] %v4172_v40  ;;  %212 = vst [vmem:[#allocation3] sm:$0xf] %v4171_v43  ;;  %v4864_v31 = vld [vmem:[%s7124_s0 + $0x834] ss:$8 sps:$4 sm:$0xff]  }
  0x40   :  { %3833 = vmatpush1.bf16.msra.mxu0 %v4830_v9  ;;  %3544 = vmatprep.subr.bf16.mxu1 %v4835_v18  ;;  %v489_v41 = vld [vmem:[#allocation2 + $0x20] sm:$0xff]  ;;  %v4862_v32 = vld [vmem:[%s7124_s0 + $0x830] ss:$8 sps:$4 sm:$0xff]   ;;  %v4885_v34 = vld [vmem:[%s7124_s0 + $0x174] ss:$8 sps:$4 sm:$0xff]  }
  0x41   :  { %3845 = vmatprep.subr.bf16.mxu0 %v4842_v25  ;;  %v4200_v44 = vcombine.high %v489_v41, %v489_v41  ;;  %v4199_v45 = vcombine.low %v489_v41, %v489_v41  ;;  %v4840_v18 = vld [vmem:[%s7124_s0 + $0x800] ss:$8 sps:$4 sm:$0xff]   ;;  %v4873_v25 = vld [vmem:[%s7124_s0 + $0x154] ss:$8 sps:$4 sm:$0xff]   ;;  %v4870_v35 = vld [vmem:[%s7124_s0 + $0x844] ss:$8 sps:$4 sm:$0xff]  }
  0x42   :  { %v4877_v33 = vld [vmem:[%s7124_s0 + $0x160] ss:$8 sps:$4 sm:$0xff]   ;;  %v4883_v37 = vld [vmem:[%s7124_s0 + $0x170] ss:$8 sps:$4 sm:$0xff]   ;;  %v4876_v42 = vld [vmem:[%s7124_s0 + $0x854] ss:$8 sps:$4 sm:$0xff]  }
  0x43   :  { %506 = vst [vmem:[#allocation3 + $0x8] sm:$0xf0] %v4200_v44  ;;  %505 = vst [vmem:[#allocation3] sm:$0xf0] %v4199_v45  ;;  %v4868_v36 = vld [vmem:[%s7124_s0 + $0x840] ss:$8 sps:$4 sm:$0xff]  }
  0x44   :  { %v4836_v46 = vld [vmem:[#allocation2 + $0xc] ss:$16 sps:$4 sm:$0x3e]   ;;  %v4845_v47 = vld [vmem:[#allocation2 + $0x8] ss:$16 sps:$4 sm:$0x3e]  }
  0x45   :  { %v349_v50 = vshrl.u32 %v4836_v46, 16  ;;  %v352_v51 = vshll.u32 %v4836_v46, 16  ;;  %v4838_v52 = vld [vmem:[#allocation2 + $0x2c] ss:$16 sps:$4 sm:$0x3e]   ;;  %v341_v53 = vshrl.u32 %v4845_v47, 16 }
  0x46   :  { %v344_v57 = vshll.u32 %v4845_v47, 16  ;;  %v4846_v58 = vld [vmem:[#allocation2 + $0x28] ss:$16 sps:$4 sm:$0x3e]   ;;  %v646_v60 = vshrl.u32 %v4838_v52, 16  ;;  %v649_v61 = vshll.u32 %v4838_v52, 16 }
  0x47   :  { %v351_v55 = vrot.slane %v349_v50, 1  ;;  %v354_v56 = vrot.slane %v352_v51, 2  ;;  %v343_v63 = vrot.slane %v341_v53, 1  ;;  %v638_v3 = vshrl.u32 %v4846_v58, 16  ;;  %v5928_v38 = vld [vmem:[#allocation2 + $0x8] sm:$0xff] }
  0x48   :  { %v346_v2 = vrot.slane %v344_v57, 2  ;;  %v641_v4 = vshll.u32 %v4846_v58, 16  ;;  %v648_v5 = vrot.slane %v646_v60, 5  ;;  %v651_v6 = vrot.slane %v649_v61, 6  ;;  %v5932_v40 = vld [vmem:[#allocation2 + $0x28] sm:$0xff] }
  0x49   :  { %v355_v0 = vor.u32 %v354_v56, %v351_v55  ;;  %v640_v8 = vrot.slane %v638_v3, 5  ;;  %v4174_v39 = vcombine.high %v5928_v38, %v5928_v38  ;;  %v4173_v41 = vcombine.low %v5928_v38, %v5928_v38  ;;  %v4891_v43 = vld [vmem:[%s7124_s0 + $0x184] ss:$8 sps:$4 sm:$0xff]   ;;  %v83_v45 = vld [vmem:[#allocation2 + $0x10] sm:$0x66] }
  0x4a   :  { %v786_v59 = vld [vmem:[#allocation3 + $0x8] sm:$0xff]  ;;  %v785_v62 = vld [vmem:[#allocation3] sm:$0xff]  ;;  %v347_v7 = vor.u32 %v346_v2, %v343_v63  ;;  %v643_v9 = vrot.slane %v641_v4, 6  ;;  %v652_v11 = vor.u32 %v651_v6, %v648_v5  ;;  %v4202_v44 = vcombine.high %v5932_v40, %v5932_v40  ;;  %v4874_v52 = vld [vmem:[%s7124_s0 + $0x850] ss:$8 sps:$4 sm:$0xff]  }
  0x4b   :  { %3533 = vmatprep.mubr.bf16.mxu1 %v786_v59  ;;  %363 = vst [vmem:[#allocation3 + $0x78] sm:$0xf] %v355_v0  ;;  %v4201_v46 = vcombine.low %v5932_v40, %v5932_v40  ;;  %215 = vst [vmem:[#allocation3 + $0x18] sm:$0xf] %v4174_v39  ;;  %v84_v47 = vsel %vm5782_vm15, 0, %v83_v45  ;;  %v126_v55 = vrot.slane %v5826_v13, 4 }
  0x4c   :  { %3534 = vmatmul.mubr.bf16.vlgmr.msra.gmra.mrb[0].mxu1 %v785_v62  ;;  %362 = vst [vmem:[#allocation3 + $0x70] sm:$0xf] %v347_v7  ;;  %v644_v14 = vor.u32 %v643_v9, %v640_v8  ;;  %660 = vst [vmem:[#allocation3 + $0x78] sm:$0xf0] %v652_v11  ;;  %v4889_v51 = vld [vmem:[%s7124_s0 + $0x180] ss:$8 sps:$4 sm:$0xff]  }
  0x4d   :  { %3545 = vmatpush1.bf16.msra.mxu1 %v4833_v49  ;;  %v89_v49 = vld [vmem:[#allocation2 + $0x30] sm:$0x66]  ;;  %214 = vst [vmem:[#allocation3 + $0x10] sm:$0xf] %v4173_v41  ;;  %508 = vst [vmem:[#allocation3 + $0x18] sm:$0xf0] %v4202_v44 }
  0x4e   :  { %3546 = vmatprep.subr.bf16.mxu1 %v4849_v54  ;;  %659 = vst [vmem:[#allocation3 + $0x70] sm:$0xf0] %v644_v14  ;;  %85 = vst [vmem:[#allocation2 + $0x10] sm:$0x66] %v84_v47  ;;  %v90_v50 = vsel %vm5782_vm15, 0, %v89_v49  ;;  %v117_v54 = vrot.slane %v5809_v1, 4 }
  0x4f   :  { %507 = vst [vmem:[#allocation3 + $0x10] sm:$0xf0] %v4201_v46  ;;  %91 = vst [vmem:[#allocation2 + $0x30] sm:$0x66] %v90_v50  ;;  %v4897_v53 = vld [vmem:[%s7124_s0 + $0x194] ss:$8 sps:$4 sm:$0xff]  }
  0x50   :  { %v4895_v56 = vld [vmem:[%s7124_s0 + $0x190] ss:$8 sps:$4 sm:$0xff]   ;;  %v4880_v57 = vld [vmem:[%s7124_s0 + $0x860] ss:$8 sps:$4 sm:$0xff]   ;;  %v4903_v58 = vld [vmem:[%s7124_s0 + $0x1a4] ss:$8 sps:$4 sm:$0xff]  }
  0x51   :  { %3547 = vmatpush1.bf16.msra.mxu1 %v4847_v10  ;;  %v4888_v1 = vld [vmem:[%s7124_s0 + $0x874] ss:$8 sps:$4 sm:$0xff]   ;;  %v4901_v62 = vld [vmem:[%s7124_s0 + $0x1a0] ss:$8 sps:$4 sm:$0xff]   ;;  %v4886_v0 = vld [vmem:[%s7124_s0 + $0x870] ss:$8 sps:$4 sm:$0xff]  }
  0x52   :  { %3548 = vmatprep.subr.bf16.mxu1 %v4855_v12  ;;  %v4909_v2 = vld [vmem:[%s7124_s0 + $0x1b4] ss:$8 sps:$4 sm:$0xff]   ;;  %v4894_v3 = vld [vmem:[%s7124_s0 + $0x884] ss:$8 sps:$4 sm:$0xff]   ;;  %v4892_v4 = vld [vmem:[%s7124_s0 + $0x880] ss:$8 sps:$4 sm:$0xff]  }
  0x53   :  { %v800_v20 = vld [vmem:[#allocation3 + $0x78] sm:$0xff]  ;;  %v4915_v5 = vld [vmem:[%s7124_s0 + $0x1c4] ss:$8 sps:$4 sm:$0xff]   ;;  %v4913_v7 = vld [vmem:[%s7124_s0 + $0x1c0] ss:$8 sps:$4 sm:$0xff]  }
  0x54   :  { %3834 = vmatprep.mubr.bf16.mxu0 %v800_v20  ;;  %v788_v13 = vld [vmem:[#allocation3 + $0x18] sm:$0xff]  ;;  %v4930_v39 = vld [vmem:[%s7124_s0 + $0x8e4] ss:$8 sps:$4 sm:$0xff]   ;;  %v4928_v41 = vld [vmem:[%s7124_s0 + $0x8e0] ss:$8 sps:$4 sm:$0xff]  }
  0x55   :  { %3549 = vmatpush1.bf16.msra.mxu1 %v4853_v15  ;;  %v799_v22 = vld [vmem:[#allocation3 + $0x70] sm:$0xff]  ;;  %3576 = vmatprep.mubr.bf16.mxu1 %v788_v13  ;;  %v4906_v15 = vld [vmem:[%s7124_s0 + $0x8a4] ss:$8 sps:$4 sm:$0xff]   ;;  %v4959_v46 = vld [vmem:[%s7124_s0 + $0x220] ss:$8 sps:$4 sm:$0xff]  }
  0x56   :  { %3550 = vmatprep.subr.bf16.mxu1 %v4861_v16  ;;  %3835 = vmatmul.mubr.bf16.vlgmr.msra.gmra.mrb[0].mxu0 %v799_v22  ;;  %v139_v59 = vld [vmem:[#allocation2 + $0x10] sm:$0x33]  ;;  %v4927_v22 = vld [vmem:[%s7124_s0 + $0x1e4] ss:$8 sps:$4 sm:$0xff]   ;;  %v4946_v50 = vld [vmem:[%s7124_s0 + $0x900] ss:$8 sps:$4 sm:$0xff]  }
  0x57   :  { %3846 = vmatpush1.bf16.msra.mxu0 %v4840_v18  ;;  %v140_v60 = vsel %vm5758_vm12, %v117_v54, %v139_v59  ;;  %v145_v61 = vld [vmem:[#allocation2 + $0x30] sm:$0x33]  ;;  %v4948_v49 = vld [vmem:[%s7124_s0 + $0x904] ss:$8 sps:$4 sm:$0xff]  }
  0x58   :  { %3847 = vmatprep.subr.bf16.mxu0 %v4852_v21  ;;  %141 = vst [vmem:[#allocation2 + $0x10] sm:$0x33] %v140_v60  ;;  %v146_v63 = vsel %vm5758_vm12, %v126_v55, %v145_v61  ;;  %v4900_v6 = vld [vmem:[%s7124_s0 + $0x894] ss:$8 sps:$4 sm:$0xff]   ;;  %v4898_v8 = vld [vmem:[%s7124_s0 + $0x890] ss:$8 sps:$4 sm:$0xff]  }
  0x59   :  { %3551 = vmatpush1.bf16.msra.mxu1 %v4859_v17  ;;  %147 = vst [vmem:[#allocation2 + $0x30] sm:$0x33] %v146_v63  ;;  %v4921_v11 = vld [vmem:[%s7124_s0 + $0x1d4] ss:$8 sps:$4 sm:$0xff]   ;;  %v4904_v21 = vld [vmem:[%s7124_s0 + $0x8a0] ss:$8 sps:$4 sm:$0xff]  }
  0x5a   :  { %3552 = vmatprep.subr.bf16.mxu1 %v4867_v19  ;;  %v4919_v19 = vld [vmem:[%s7124_s0 + $0x1d0] ss:$8 sps:$4 sm:$0xff]   ;;  %v4936_v44 = vld [vmem:[%s7124_s0 + $0x8f4] ss:$8 sps:$4 sm:$0xff]   ;;  %v4964_v13 = vld [vmem:[%s7124_s0 + $0x924] ss:$8 sps:$4 sm:$0xff]  }
  0x5b   :  { %3848 = vmatpush1.bf16.msra.mxu0 %v4850_v23  ;;  %v4912_v23 = vld [vmem:[%s7124_s0 + $0x8b4] ss:$8 sps:$4 sm:$0xff]   ;;  %v4934_v45 = vld [vmem:[%s7124_s0 + $0x8f0] ss:$8 sps:$4 sm:$0xff]  }
  0x5c   :  { %3849 = vmatprep.subr.bf16.mxu0 %v4858_v26  ;;  %v4933_v26 = vld [vmem:[%s7124_s0 + $0x1f4] ss:$8 sps:$4 sm:$0xff]  }
  0x5d   :  { %3553 = vmatpush1.bf16.msra.mxu1 %v4865_v24  ;;  %v4925_v24 = vld [vmem:[%s7124_s0 + $0x1e0] ss:$8 sps:$4 sm:$0xff]   ;;  %v4967_v47 = vld [vmem:[%s7124_s0 + $0x234] ss:$8 sps:$4 sm:$0xff]  }
  0x5e   :  { %3554 = vmatprep.subr.bf16.mxu1 %v4873_v25  ;;  %v4910_v25 = vld [vmem:[%s7124_s0 + $0x8b0] ss:$8 sps:$4 sm:$0xff]   ;;  %v4979_v59 = vld [vmem:[%s7124_s0 + $0x254] ss:$8 sps:$4 sm:$0xff]  }
  0x5f   :  { %3850 = vmatpush1.bf16.msra.mxu0 %v4856_v27  ;;  %v4942_v9 = vld [vmem:[#allocation2 + $0x4] ss:$16 sps:$4 sm:$0x3c]   ;;  %v4951_v14 = vld [vmem:[#allocation2] ss:$16 sps:$4 sm:$0x3c]  }
  0x60   :  { %3851 = vmatprep.subr.bf16.mxu0 %v4864_v31  ;;  %v4944_v10 = vld [vmem:[#allocation2 + $0x24] ss:$16 sps:$4 sm:$0x3c]   ;;  %v385_v12 = vrot.slane %v4942_v9, 2  ;;  %v384_v18 = vrot.slane %v4951_v14, 2 }
  0x61   :  { %3555 = vmatpush1.bf16.msra.mxu1 %v4871_v28  ;;  %v682_v16 = vrot.slane %v4944_v10, 6  ;;  %v4952_v17 = vld [vmem:[#allocation2 + $0x20] ss:$16 sps:$4 sm:$0x3c]   ;;  %v4918_v27 = vld [vmem:[%s7124_s0 + $0x8c4] ss:$8 sps:$4 sm:$0xff]  }
  0x62   :  { %3556 = vmatprep.subr.bf16.mxu1 %v4879_v29  ;;  %393 = vst [vmem:[#allocation3 + $0x88] sm:$0xf] %v385_v12  ;;  %v681_v20 = vrot.slane %v4952_v17, 6  ;;  %392 = vst [vmem:[#allocation3 + $0x80] sm:$0xf] %v384_v18 }
  0x63   :  { %3852 = vmatpush1.bf16.msra.mxu0 %v4862_v32  ;;  %690 = vst [vmem:[#allocation3 + $0x88] sm:$0xf0] %v682_v16  ;;  %v4931_v29 = vld [vmem:[%s7124_s0 + $0x1f0] ss:$8 sps:$4 sm:$0xff]   ;;  %v4916_v31 = vld [vmem:[%s7124_s0 + $0x8c0] ss:$8 sps:$4 sm:$0xff]  }
  0x64   :  { %3853 = vmatprep.subr.bf16.mxu0 %v4870_v35  ;;  %689 = vst [vmem:[#allocation3 + $0x80] sm:$0xf0] %v681_v20  ;;  %v4941_v32 = vld [vmem:[%s7124_s0 + $0x204] ss:$8 sps:$4 sm:$0xff]   ;;  %v4939_v35 = vld [vmem:[%s7124_s0 + $0x200] ss:$8 sps:$4 sm:$0xff]  }
  0x65   :  { %3557 = vmatpush1.bf16.msra.mxu1 %v4877_v33  ;;  %v4924_v33 = vld [vmem:[%s7124_s0 + $0x8d4] ss:$8 sps:$4 sm:$0xff]   ;;  %v5058_v12 = vld [vmem:[#allocation2 + $0x20] ss:$16 sps:$4 sm:$0x1f]  }
  0x66   :  { %3558 = vmatprep.subr.bf16.mxu1 %v4885_v34  ;;  %v4922_v34 = vld [vmem:[%s7124_s0 + $0x8d0] ss:$8 sps:$4 sm:$0xff]   ;;  %v5043_v54 = vld [vmem:[#allocation2 + $0x4] ss:$16 sps:$4 sm:$0x1f]   ;;  %v533_v20 = vshll.u32 %v5058_v12, 16 }
  0x67   :  { %3854 = vmatpush1.bf16.msra.mxu0 %v4868_v36  ;;  %v787_v36 = vld [vmem:[#allocation3 + $0x10] sm:$0xff]  ;;  %v5050_v63 = vld [vmem:[#allocation2 + $0xc] ss:$16 sps:$4 sm:$0x3c]   ;;  %v4983_v18 = vld [vmem:[%s7124_s0 + $0x260] ss:$8 sps:$4 sm:$0xff]  }
  0x68   :  { %3855 = vmatprep.subr.bf16.mxu0 %v4876_v42  ;;  %v4953_v42 = vld [vmem:[%s7124_s0 + $0x210] ss:$8 sps:$4 sm:$0xff]   ;;  %v5045_v55 = vld [vmem:[#allocation2 + $0x24] ss:$16 sps:$4 sm:$0x1f]  }
  0x69   :  { %3559 = vmatpush1.bf16.msra.mxu1 %v4883_v37  ;;  %v4955_v37 = vld [vmem:[%s7124_s0 + $0x214] ss:$8 sps:$4 sm:$0xff]   ;;  %v538_v60 = vshrl.u32 %v5045_v55, 16  ;;  %v541_v61 = vshll.u32 %v5045_v55, 16 }
  0x6a   :  { %3560 = vmatprep.subr.bf16.mxu1 %v4891_v43  ;;  %v802_v28 = vld [vmem:[#allocation3 + $0x88] sm:$0xff]  ;;  %v5006_v55 = vld [vmem:[%s7124_s0 + $0x994] ss:$8 sps:$4 sm:$0xff]  }
  0x6b   :  { %3856 = vmatpush1.bf16.msra.mxu0 %v4874_v52  ;;  %3877 = vmatprep.mubr.bf16.mxu0 %v802_v28  ;;  %v4961_v43 = vld [vmem:[%s7124_s0 + $0x224] ss:$8 sps:$4 sm:$0xff]   ;;  %v5059_v14 = vld [vmem:[#allocation2 + $0x8] ss:$16 sps:$4 sm:$0x3c]   ;;  %v535_v28 = vrot.slane %v533_v20, 5 }
  0x6c   :  { %3857 = vmatprep.subr.bf16.mxu0 %v4882_v48  ;;  %v801_v52 = vld [vmem:[#allocation3 + $0x80] sm:$0xff]  ;;  %v5060_v17 = vld [vmem:[#allocation2 + $0x28] ss:$16 sps:$4 sm:$0x3c]  }
  0x6d   :  { %3561 = vmatpush1.bf16.msra.mxu1 %v4889_v51  ;;  %v4965_v51 = vld [vmem:[%s7124_s0 + $0x230] ss:$8 sps:$4 sm:$0xff]   ;;  %v4973_v48 = vld [vmem:[%s7124_s0 + $0x244] ss:$8 sps:$4 sm:$0xff]  }
  0x6e   :  { %3562 = vmatprep.subr.bf16.mxu1 %v4897_v53  ;;  %v4958_v53 = vld [vmem:[%s7124_s0 + $0x914] ss:$8 sps:$4 sm:$0xff]  }
  0x6f   :  { %3858 = vmatpush1.bf16.msra.mxu0 %v4880_v57  ;;  %v4971_v57 = vld [vmem:[%s7124_s0 + $0x240] ss:$8 sps:$4 sm:$0xff]  }
  0x70   :  { %3859 = vmatprep.subr.bf16.mxu0 %v4888_v1  ;;  %v246_v1 = vshll.u32 %v5043_v54, 16 }
  0x71   :  { %3563 = vmatpush1.bf16.msra.mxu1 %v4895_v56  ;;  %v4956_v56 = vld [vmem:[%s7124_s0 + $0x910] ss:$8 sps:$4 sm:$0xff]  }
  0x72   :  { %3564 = vmatprep.subr.bf16.mxu1 %v4903_v58  ;;  %v244_v58 = vshrl.u32 %v5043_v54, 16  ;;  %v5021_v54 = vld [vmem:[%s7124_s0 + $0x2c4] ss:$8 sps:$4 sm:$0xff]  }
  0x73   :  { %3860 = vmatpush1.bf16.msra.mxu0 %v4886_v0  ;;  %v540_v0 = vrot.slane %v538_v60, 4  ;;  %v5033_v60 = vld [vmem:[%s7124_s0 + $0x2e4] ss:$8 sps:$4 sm:$0xff]  }
  0x74   :  { %3861 = vmatprep.subr.bf16.mxu0 %v4894_v3  ;;  %v4962_v3 = vld [vmem:[%s7124_s0 + $0x920] ss:$8 sps:$4 sm:$0xff]  }
  0x75   :  { %3565 = vmatpush1.bf16.msra.mxu1 %v4901_v62  ;;  %v248_v62 = vrot.slane %v246_v1, 1  ;;  %v5012_v1 = vld [vmem:[%s7124_s0 + $0x9a4] ss:$8 sps:$4 sm:$0xff]  }
  0x76   :  { %3566 = vmatprep.subr.bf16.mxu1 %v4909_v2  ;;  %v543_v2 = vrot.slane %v541_v61, 5  ;;  %v5018_v61 = vld [vmem:[%s7124_s0 + $0x9b4] ss:$8 sps:$4 sm:$0xff]  }
  0x77   :  { %3862 = vmatpush1.bf16.msra.mxu0 %v4892_v4  ;;  %v387_v4 = vrot.slane %v5050_v63, 2  ;;  %v5016_v63 = vld [vmem:[%s7124_s0 + $0x9b0] ss:$8 sps:$4 sm:$0xff]  }
  0x78   :  { %3863 = vmatprep.subr.bf16.mxu0 %v4900_v6  ;;  %v4970_v6 = vld [vmem:[%s7124_s0 + $0x934] ss:$8 sps:$4 sm:$0xff]   ;;  %v544_v9 = vor.u32 %v543_v2, %v540_v0  ;;  %v5024_v2 = vld [vmem:[%s7124_s0 + $0x9c4] ss:$8 sps:$4 sm:$0xff]  }
  0x79   :  { %3567 = vmatpush1.bf16.msra.mxu1 %v4907_v30  ;;  %v249_v30 = vor.u32 %v248_v62, %v244_v58  ;;  %395 = vst [vmem:[#allocation3 + $0x98] sm:$0xf] %v387_v4  ;;  %v5027_v58 = vld [vmem:[%s7124_s0 + $0x2d4] ss:$8 sps:$4 sm:$0xff]   ;;  %v5031_v62 = vld [vmem:[%s7124_s0 + $0x2e0] ss:$8 sps:$4 sm:$0xff]  }
  0x7a   :  { %3568 = vmatprep.subr.bf16.mxu1 %v4915_v5  ;;  %v5052_v5 = vld [vmem:[#allocation2 + $0x2c] ss:$16 sps:$4 sm:$0x3c]   ;;  %566 = vst [vmem:[#allocation3 + $0x28] sm:$0xf0] %v544_v9 }
  0x7b   :  { %3864 = vmatpush1.bf16.msra.mxu0 %v4898_v8  ;;  %v4985_v8 = vld [vmem:[%s7124_s0 + $0x264] ss:$8 sps:$4 sm:$0xff]   ;;  %269 = vst [vmem:[#allocation3 + $0x28] sm:$0xf] %v249_v30  ;;  %v684_v10 = vrot.slane %v5052_v5, 6 }
  0x7c   :  { %3865 = vmatprep.subr.bf16.mxu0 %v4906_v15  ;;  %v5039_v0 = vld [vmem:[%s7124_s0 + $0x2f4] ss:$8 sps:$4 sm:$0xff]   ;;  %v5022_v30 = vld [vmem:[%s7124_s0 + $0x9c0] ss:$8 sps:$4 sm:$0xff]   ;;  %v5049_v4 = vld [vmem:[%s7124_s0 + $0x304] ss:$8 sps:$4 sm:$0xff]  }
  0x7d   :  { %3569 = vmatpush1.bf16.msra.mxu1 %v4913_v7  ;;  %v4977_v7 = vld [vmem:[%s7124_s0 + $0x250] ss:$8 sps:$4 sm:$0xff]   ;;  %692 = vst [vmem:[#allocation3 + $0x98] sm:$0xf0] %v684_v10  ;;  %v5030_v5 = vld [vmem:[%s7124_s0 + $0x9d4] ss:$8 sps:$4 sm:$0xff]  }
  0x7e   :  { %3570 = vmatprep.subr.bf16.mxu1 %v4921_v11  ;;  %v5057_v11 = vld [vmem:[#allocation2] ss:$16 sps:$4 sm:$0x1f]   ;;  %v5063_v9 = vld [vmem:[%s7124_s0 + $0x314] ss:$8 sps:$4 sm:$0xff]  }
  0x7f   :  { %3866 = vmatpush1.bf16.msra.mxu0 %v4904_v21  ;;  %v237_v15 = vshrl.u32 %v5057_v11, 16  ;;  %v239_v16 = vshll.u32 %v5057_v11, 16  ;;  %v386_v21 = vrot.slane %v5059_v14, 2  ;;  %v219_v10 = vld [vmem:[#allocation2 + $0x18] sm:$0x11] }
  0x80   :  { %3867 = vmatprep.subr.bf16.mxu0 %v4912_v23  ;;  %v4991_v23 = vld [vmem:[%s7124_s0 + $0x274] ss:$8 sps:$4 sm:$0xff]   ;;  %v4178_v11 = vcombine.high %v5928_v38, %v219_v10  ;;  %v5036_v14 = vld [vmem:[%s7124_s0 + $0x9e4] ss:$8 sps:$4 sm:$0xff]  }
  0x81   :  { %3571 = vmatpush1.bf16.msra.mxu1 %v4919_v19  ;;  %v530_v19 = vshrl.u32 %v5058_v12, 16  ;;  %394 = vst [vmem:[#allocation3 + $0x90] sm:$0xf] %v386_v21  ;;  %v512_v12 = vld [vmem:[#allocation2 + $0x38] sm:$0x11] }
  0x82   :  { %3572 = vmatprep.subr.bf16.mxu1 %v4927_v22  ;;  %v4968_v22 = vld [vmem:[%s7124_s0 + $0x930] ss:$8 sps:$4 sm:$0xff]   ;;  %v260_v20 = vshll.u32 %v4178_v11, 16  ;;  %v5042_v21 = vld [vmem:[%s7124_s0 + $0x9f4] ss:$8 sps:$4 sm:$0xff]  }
  0x83   :  { %3868 = vmatpush1.bf16.msra.mxu0 %v4910_v25  ;;  %v683_v25 = vrot.slane %v5060_v17, 6  ;;  %v5034_v17 = vld [vmem:[%s7124_s0 + $0x9e0] ss:$8 sps:$4 sm:$0xff]  }
  0x84   :  { %3869 = vmatprep.subr.bf16.mxu0 %v4918_v27  ;;  %v532_v27 = vrot.slane %v530_v19, 4  ;;  %v258_v19 = vshrl.u32 %v4178_v11, 16 }
  0x85   :  { %3573 = vmatpush1.bf16.msra.mxu1 %v4925_v24  ;;  %v241_v24 = vrot.slane %v239_v16, 1  ;;  %691 = vst [vmem:[#allocation3 + $0x90] sm:$0xf0] %v683_v25  ;;  %v4206_v16 = vcombine.high %v5932_v40, %v512_v12  ;;  %v262_v25 = vrot.slane %v260_v20, 1  ;;  %v5091_v20 = vld [vmem:[%s7124_s0 + $0x360] ss:$8 sps:$4 sm:$0xff]  }
  0x86   :  { %3574 = vmatprep.subr.bf16.mxu1 %v4933_v26  ;;  %v4976_v26 = vld [vmem:[%s7124_s0 + $0x944] ss:$8 sps:$4 sm:$0xff]  }
  0x87   :  { %3870 = vmatpush1.bf16.msra.mxu0 %v4916_v31  ;;  %v4974_v31 = vld [vmem:[%s7124_s0 + $0x940] ss:$8 sps:$4 sm:$0xff]  }
  0x88   :  { %3871 = vmatprep.subr.bf16.mxu0 %v4924_v33  ;;  %v536_v33 = vor.u32 %v535_v28, %v532_v27  ;;  %v4177_v27 = vcombine.low %v5928_v38, %v219_v10  ;;  %v4205_v28 = vcombine.low %v5932_v40, %v512_v12  ;;  %v263_v38 = vor.u32 %v262_v25, %v258_v19  ;;  %v5072_v12 = vld [vmem:[%s7124_s0 + $0xa24] ss:$8 sps:$4 sm:$0xff]   ;;  %v5076_v19 = vld [vmem:[%s7124_s0 + $0xa30] ss:$8 sps:$4 sm:$0xff]  }
  0x89   :  { %3575 = vmatpush1.bf16.msra.mxu1 %v4931_v29  ;;  %v242_v29 = vor.u32 %v241_v24, %v237_v15  ;;  %v5061_v15 = vld [vmem:[%s7124_s0 + $0x310] ss:$8 sps:$4 sm:$0xff]   ;;  %v5156_v24 = vld [vmem:[#allocation2 + $0x4] ss:$16 sps:$4 sm:$0x7c]  }
  0x8a   :  { %3587 = vmatprep.subr.bf16.mxu1 %v4941_v32  ;;  %v4989_v32 = vld [vmem:[%s7124_s0 + $0x270] ss:$8 sps:$4 sm:$0xff]   ;;  %565 = vst [vmem:[#allocation3 + $0x20] sm:$0xf0] %v536_v33  ;;  %v428_v33 = vshll.u32 %v5156_v24, 16 }
  0x8b   :  { %3872 = vmatpush1.bf16.msra.mxu0 %v4922_v34  ;;  %v4997_v34 = vld [vmem:[%s7124_s0 + $0x284] ss:$8 sps:$4 sm:$0xff]   ;;  %268 = vst [vmem:[#allocation3 + $0x20] sm:$0xf] %v242_v29  ;;  %271 = vst [vmem:[#allocation3 + $0x38] sm:$0xf] %v263_v38 }
  0x8c   :  { %3577 = vmatmul.mubr.bf16.vlgmr.msra.gmra.mrb[0].mxu1 %v787_v36  ;;  %3873 = vmatprep.subr.bf16.mxu0 %v4930_v39  ;;  %v4982_v36 = vld [vmem:[%s7124_s0 + $0x954] ss:$8 sps:$4 sm:$0xff]   ;;  %v4980_v39 = vld [vmem:[%s7124_s0 + $0x950] ss:$8 sps:$4 sm:$0xff]   ;;  %v5105_v25 = vld [vmem:[%s7124_s0 + $0x384] ss:$8 sps:$4 sm:$0xff]  }
  0x8d   :  { %3588 = vmatpush1.bf16.msra.mxu1 %v4939_v35  ;;  %v790_v35 = vld [vmem:[#allocation3 + $0x28] sm:$0xff] }
  0x8e   :  { %3589 = vmatprep.subr.bf16.mxu1 %v4955_v37  ;;  %3619 = vmatprep.mubr.bf16.mxu1 %v790_v35  ;;  %v804_v37 = vld [vmem:[#allocation3 + $0x98] sm:$0xff]  ;;  %v5067_v35 = vld [vmem:[%s7124_s0 + $0x320] ss:$8 sps:$4 sm:$0xff]  }
  0x8f   :  { %3874 = vmatpush1.bf16.msra.mxu0 %v4928_v41  ;;  %v4995_v41 = vld [vmem:[%s7124_s0 + $0x280] ss:$8 sps:$4 sm:$0xff]  }
  0x90   :  { %3875 = vmatprep.subr.bf16.mxu0 %v4936_v44  ;;  %v5001_v44 = vld [vmem:[%s7124_s0 + $0x290] ss:$8 sps:$4 sm:$0xff]   ;;  %v5115_v38 = vld [vmem:[%s7124_s0 + $0x3a0] ss:$8 sps:$4 sm:$0xff]  }
  0x91   :  { %3590 = vmatpush1.bf16.msra.mxu1 %v4953_v42  ;;  %v5003_v42 = vld [vmem:[%s7124_s0 + $0x294] ss:$8 sps:$4 sm:$0xff]  }
  0x92   :  { %3591 = vmatprep.subr.bf16.mxu1 %v4961_v43  ;;  %v4988_v43 = vld [vmem:[%s7124_s0 + $0x964] ss:$8 sps:$4 sm:$0xff]  }
  0x93   :  { %3876 = vmatpush1.bf16.msra.mxu0 %v4934_v45  ;;  %v4986_v45 = vld [vmem:[%s7124_s0 + $0x960] ss:$8 sps:$4 sm:$0xff]  }
  0x94   :  { %3888 = vmatprep.subr.bf16.mxu0 %v4948_v49  ;;  %v5007_v49 = vld [vmem:[%s7124_s0 + $0x2a0] ss:$8 sps:$4 sm:$0xff]  }
  0x95   :  { %3592 = vmatpush1.bf16.msra.mxu1 %v4959_v46  ;;  %v5009_v46 = vld [vmem:[%s7124_s0 + $0x2a4] ss:$8 sps:$4 sm:$0xff]  }
  0x96   :  { %3593 = vmatprep.subr.bf16.mxu1 %v4967_v47  ;;  %3878 = vmatmul.mubr.bf16.vlgmr.msra.gmra.mrb[0].mxu0 %v801_v52  ;;  %v4994_v47 = vld [vmem:[%s7124_s0 + $0x974] ss:$8 sps:$4 sm:$0xff]   ;;  %v5000_v52 = vld [vmem:[%s7124_s0 + $0x984] ss:$8 sps:$4 sm:$0xff]  }
  0x97   :  { %3889 = vmatpush1.bf16.msra.mxu0 %v4946_v50  ;;  %3920 = vmatprep.mubr.bf16.mxu0 %v804_v37  ;;  %v4992_v50 = vld [vmem:[%s7124_s0 + $0x970] ss:$8 sps:$4 sm:$0xff]  }
  0x98   :  { %3890 = vmatprep.subr.bf16.mxu0 %v4958_v53  ;;  %v5013_v53 = vld [vmem:[%s7124_s0 + $0x2b0] ss:$8 sps:$4 sm:$0xff]  }
  0x99   :  { %3594 = vmatpush1.bf16.msra.mxu1 %v4965_v51  ;;  %v5015_v51 = vld [vmem:[%s7124_s0 + $0x2b4] ss:$8 sps:$4 sm:$0xff]  }
  0x9a   :  { %3595 = vmatprep.subr.bf16.mxu1 %v4973_v48  ;;  %v4998_v48 = vld [vmem:[%s7124_s0 + $0x980] ss:$8 sps:$4 sm:$0xff]  }
  0x9b   :  { %3891 = vmatpush1.bf16.msra.mxu0 %v4956_v56  ;;  %v5019_v56 = vld [vmem:[%s7124_s0 + $0x2c0] ss:$8 sps:$4 sm:$0xff]  }
  0x9c   :  { %3892 = vmatprep.subr.bf16.mxu0 %v4964_v13  ;;  %v5025_v13 = vld [vmem:[%s7124_s0 + $0x2d0] ss:$8 sps:$4 sm:$0xff]  }
  0x9d   :  { %3596 = vmatpush1.bf16.msra.mxu1 %v4971_v57  ;;  %v5004_v57 = vld [vmem:[%s7124_s0 + $0x990] ss:$8 sps:$4 sm:$0xff]  }
  0x9e   :  { %3597 = vmatprep.subr.bf16.mxu1 %v4979_v59  ;;  %v5010_v59 = vld [vmem:[%s7124_s0 + $0x9a0] ss:$8 sps:$4 sm:$0xff]  }
  0x9f   :  { %3893 = vmatpush1.bf16.msra.mxu0 %v4962_v3  ;;  %v5037_v3 = vld [vmem:[%s7124_s0 + $0x2f0] ss:$8 sps:$4 sm:$0xff]  }
  0xa0   :  { %3894 = vmatprep.subr.bf16.mxu0 %v4970_v6  ;;  %v5028_v6 = vld [vmem:[%s7124_s0 + $0x9d0] ss:$8 sps:$4 sm:$0xff]  }
  0xa1   :  { %3598 = vmatpush1.bf16.msra.mxu1 %v4977_v7  ;;  %v5047_v7 = vld [vmem:[%s7124_s0 + $0x300] ss:$8 sps:$4 sm:$0xff]  }
  0xa2   :  { %3599 = vmatprep.subr.bf16.mxu1 %v4985_v8  ;;  %v789_v8 = vld [vmem:[#allocation3 + $0x20] sm:$0xff] }
  0xa3   :  { %3895 = vmatpush1.bf16.msra.mxu0 %v4968_v22  ;;  %v554_v22 = vshrl.u32 %v4206_v16, 16 }
  0xa4   :  { %3896 = vmatprep.subr.bf16.mxu0 %v4976_v26  ;;  %v5158_v26 = vld [vmem:[#allocation2 + $0x24] ss:$16 sps:$4 sm:$0x7c]  }
  0xa5   :  { %3600 = vmatpush1.bf16.msra.mxu1 %v4983_v18  ;;  %v5069_v18 = vld [vmem:[%s7124_s0 + $0x324] ss:$8 sps:$4 sm:$0xff]   ;;  %v556_v29 = vrot.slane %v554_v22, 4  ;;  %v722_v37 = vshrl.u32 %v5158_v26, 16  ;;  %v725_v40 = vshll.u32 %v5158_v26, 16 }
  0xa6   :  { %3601 = vmatprep.subr.bf16.mxu1 %v4991_v23  ;;  %v557_v23 = vshll.u32 %v4206_v16, 16  ;;  %v5070_v16 = vld [vmem:[%s7124_s0 + $0xa20] ss:$8 sps:$4 sm:$0xff]   ;;  %v5084_v22 = vld [vmem:[%s7124_s0 + $0xa44] ss:$8 sps:$4 sm:$0xff]  }
  0xa7   :  { %3897 = vmatpush1.bf16.msra.mxu0 %v4974_v31  ;;  %v5090_v26 = vld [vmem:[%s7124_s0 + $0xa54] ss:$8 sps:$4 sm:$0xff]  }
  0xa8   :  { %3898 = vmatprep.subr.bf16.mxu0 %v4982_v36  ;;  %v559_v31 = vrot.slane %v557_v23, 5  ;;  %v5075_v36 = vld [vmem:[%s7124_s0 + $0x334] ss:$8 sps:$4 sm:$0xff]   ;;  %v5082_v23 = vld [vmem:[%s7124_s0 + $0xa40] ss:$8 sps:$4 sm:$0xff]  }
  0xa9   :  { %3602 = vmatpush1.bf16.msra.mxu1 %v4989_v32  ;;  %v425_v32 = vshrl.u32 %v5156_v24, 16  ;;  %v5097_v24 = vld [vmem:[%s7124_s0 + $0x370] ss:$8 sps:$4 sm:$0xff]  }
  0xaa   :  { %3603 = vmatprep.subr.bf16.mxu1 %v4997_v34  ;;  %v5040_v34 = vld [vmem:[%s7124_s0 + $0x9f0] ss:$8 sps:$4 sm:$0xff]  }
  0xab   :  { %3899 = vmatpush1.bf16.msra.mxu0 %v4980_v39  ;;  %v5056_v39 = vld [vmem:[%s7124_s0 + $0xa04] ss:$8 sps:$4 sm:$0xff]  }
  0xac   :  { %3900 = vmatprep.subr.bf16.mxu0 %v4988_v43  ;;  %v430_v43 = vrot.slane %v428_v33, 3  ;;  %v5109_v33 = vld [vmem:[%s7124_s0 + $0x390] ss:$8 sps:$4 sm:$0xff]  }
  0xad   :  { %3604 = vmatpush1.bf16.msra.mxu1 %v4995_v41  ;;  %v560_v41 = vor.u32 %v559_v31, %v556_v29  ;;  %v5111_v29 = vld [vmem:[%s7124_s0 + $0x394] ss:$8 sps:$4 sm:$0xff]   ;;  %v5096_v31 = vld [vmem:[%s7124_s0 + $0xa64] ss:$8 sps:$4 sm:$0xff]  }
  0xae   :  { %3605 = vmatprep.subr.bf16.mxu1 %v5003_v42  ;;  %v427_v42 = vrot.slane %v425_v32, 2  ;;  %v5094_v32 = vld [vmem:[%s7124_s0 + $0xa60] ss:$8 sps:$4 sm:$0xff]  }
  0xaf   :  { %3901 = vmatpush1.bf16.msra.mxu0 %v4986_v45  ;;  %v5165_v45 = vld [vmem:[#allocation2] ss:$16 sps:$4 sm:$0x7c]   ;;  %568 = vst [vmem:[#allocation3 + $0x38] sm:$0xf0] %v560_v41 }
  0xb0   :  { %3902 = vmatprep.subr.bf16.mxu0 %v4994_v47  ;;  %v727_v47 = vrot.slane %v725_v40, 7  ;;  %v5108_v40 = vld [vmem:[%s7124_s0 + $0xa84] ss:$8 sps:$4 sm:$0xff]   ;;  %v5121_v41 = vld [vmem:[%s7124_s0 + $0x3b0] ss:$8 sps:$4 sm:$0xff]  }
  0xb1   :  { %3606 = vmatpush1.bf16.msra.mxu1 %v5001_v44  ;;  %v251_v44 = vshrl.u32 %v4177_v27, 16 }
  0xb2   :  { %3607 = vmatprep.subr.bf16.mxu1 %v5009_v46  ;;  %v724_v46 = vrot.slane %v722_v37, 6  ;;  %v5123_v37 = vld [vmem:[%s7124_s0 + $0x3b4] ss:$8 sps:$4 sm:$0xff]  }
  0xb3   :  { %3903 = vmatpush1.bf16.msra.mxu0 %v4992_v50  ;;  %v546_v50 = vshrl.u32 %v4205_v28, 16 }
  0xb4   :  { %3904 = vmatprep.subr.bf16.mxu0 %v5000_v52  ;;  %v549_v52 = vshll.u32 %v4205_v28, 16  ;;  %v5103_v28 = vld [vmem:[%s7124_s0 + $0x380] ss:$8 sps:$4 sm:$0xff]  }
  0xb5   :  { %3608 = vmatpush1.bf16.msra.mxu1 %v5007_v49  ;;  %v253_v49 = vshll.u32 %v4177_v27, 16  ;;  %v5088_v27 = vld [vmem:[%s7124_s0 + $0xa50] ss:$8 sps:$4 sm:$0xff]  }
  0xb6   :  { %3609 = vmatprep.subr.bf16.mxu1 %v5015_v51  ;;  %v431_v51 = vor.u32 %v430_v43, %v427_v42  ;;  %v792_v10 = vld [vmem:[#allocation3 + $0x38] sm:$0xff]  ;;  %v5129_v42 = vld [vmem:[%s7124_s0 + $0x3c4] ss:$8 sps:$4 sm:$0xff]  }
  0xb7   :  { %3905 = vmatpush1.bf16.msra.mxu0 %v4998_v48  ;;  %v420_v48 = vshll.u32 %v5165_v45, 16  ;;  %v5114_v43 = vld [vmem:[%s7124_s0 + $0xa94] ss:$8 sps:$4 sm:$0xff]  }
  0xb8   :  { %3906 = vmatprep.subr.bf16.mxu0 %v5006_v55  ;;  %v5054_v55 = vld [vmem:[%s7124_s0 + $0xa00] ss:$8 sps:$4 sm:$0xff]   ;;  %453 = vst [vmem:[#allocation3 + $0xa8] sm:$0xf] %v431_v51  ;;  %v5141_v51 = vld [vmem:[%s7124_s0 + $0x3e4] ss:$8 sps:$4 sm:$0xff]  }
  0xb9   :  { %3610 = vmatpush1.bf16.msra.mxu1 %v5013_v53  ;;  %v417_v53 = vshrl.u32 %v5165_v45, 16  ;;  %v5127_v45 = vld [vmem:[%s7124_s0 + $0x3c0] ss:$8 sps:$4 sm:$0xff]  }
  0xba   :  { %3611 = vmatprep.subr.bf16.mxu1 %v5021_v54  ;;  %v5166_v54 = vld [vmem:[#allocation2 + $0x20] ss:$16 sps:$4 sm:$0x7c]  }
  0xbb   :  { %3907 = vmatpush1.bf16.msra.mxu0 %v5004_v57  ;;  %v728_v57 = vor.u32 %v727_v47, %v724_v46  ;;  %v5135_v46 = vld [vmem:[%s7124_s0 + $0x3d4] ss:$8 sps:$4 sm:$0xff]   ;;  %v5120_v47 = vld [vmem:[%s7124_s0 + $0xaa4] ss:$8 sps:$4 sm:$0xff]  }
  0xbc   :  { %3908 = vmatprep.subr.bf16.mxu0 %v5012_v1  ;;  %v548_v1 = vrot.slane %v546_v50, 4  ;;  %v5133_v50 = vld [vmem:[%s7124_s0 + $0x3d0] ss:$8 sps:$4 sm:$0xff]  }
  0xbd   :  { %3612 = vmatpush1.bf16.msra.mxu1 %v5019_v56  ;;  %v5073_v56 = vld [vmem:[%s7124_s0 + $0x330] ss:$8 sps:$4 sm:$0xff]   ;;  %750 = vst [vmem:[#allocation3 + $0xa8] sm:$0xf0] %v728_v57 }
  0xbe   :  { %3613 = vmatprep.subr.bf16.mxu1 %v5027_v58  ;;  %v255_v58 = vrot.slane %v253_v49, 1  ;;  %v5118_v49 = vld [vmem:[%s7124_s0 + $0xaa0] ss:$8 sps:$4 sm:$0xff]  }
  0xbf   :  { %3909 = vmatpush1.bf16.msra.mxu0 %v5010_v59  ;;  %v419_v59 = vrot.slane %v417_v53, 2  ;;  %v5257_v53 = vld [vmem:[#allocation2 + $0x4] ss:$16 sps:$4 sm:$0x1e]  }
  0xc0   :  { %3910 = vmatprep.subr.bf16.mxu0 %v5018_v61  ;;  %v714_v61 = vshrl.u32 %v5166_v54, 16  ;;  %v293_v57 = vrot.slane %v5257_v53, 1  ;;  %v5176_v53 = vld [vmem:[%s7124_s0 + $0xb20] ss:$8 sps:$4 sm:$0xff]  }
  0xc1   :  { %3614 = vmatpush1.bf16.msra.mxu1 %v5025_v13  ;;  %v551_v13 = vrot.slane %v549_v52, 5  ;;  %v5126_v52 = vld [vmem:[%s7124_s0 + $0xab4] ss:$8 sps:$4 sm:$0xff]  }
  0xc2   :  { %3615 = vmatprep.subr.bf16.mxu1 %v5033_v60  ;;  %v422_v60 = vrot.slane %v420_v48, 3  ;;  %v5139_v48 = vld [vmem:[%s7124_s0 + $0x3e0] ss:$8 sps:$4 sm:$0xff]   ;;  %301 = vst [vmem:[#allocation3 + $0x48] sm:$0xf] %v293_v57 }
  0xc3   :  { %3911 = vmatpush1.bf16.msra.mxu0 %v5016_v63  ;;  %v5081_v63 = vld [vmem:[%s7124_s0 + $0x344] ss:$8 sps:$4 sm:$0xff]   ;;  %v5197_v57 = vld [vmem:[%s7124_s0 + $0x460] ss:$8 sps:$4 sm:$0xff]  }
  0xc4   :  { %3912 = vmatprep.subr.bf16.mxu0 %v5024_v2  ;;  %v717_v2 = vshll.u32 %v5166_v54, 16  ;;  %v5259_v54 = vld [vmem:[#allocation2 + $0x24] ss:$16 sps:$4 sm:$0x1e]  }
  0xc5   :  { %3616 = vmatpush1.bf16.msra.mxu1 %v5031_v62  ;;  %v803_v62 = vld [vmem:[#allocation3 + $0x90] sm:$0xff] }
  0xc6   :  { %3617 = vmatprep.subr.bf16.mxu1 %v5039_v0  ;;  %v256_v0 = vor.u32 %v255_v58, %v251_v44  ;;  %v5112_v44 = vld [vmem:[%s7124_s0 + $0xa90] ss:$8 sps:$4 sm:$0xff]   ;;  %v5132_v58 = vld [vmem:[%s7124_s0 + $0xac4] ss:$8 sps:$4 sm:$0xff]  }
  0xc7   :  { %3913 = vmatpush1.bf16.msra.mxu0 %v5022_v30  ;;  %v552_v30 = vor.u32 %v551_v13, %v548_v1  ;;  %v590_v1 = vrot.slane %v5259_v54, 5  ;;  %v5264_v13 = vld [vmem:[#allocation2 + $0xc] ss:$16 sps:$4 sm:$0x7c]  }
  0xc8   :  { %3914 = vmatprep.subr.bf16.mxu0 %v5030_v5  ;;  %v716_v5 = vrot.slane %v714_v61, 6  ;;  %270 = vst [vmem:[#allocation3 + $0x30] sm:$0xf] %v256_v0  ;;  %v5266_v61 = vld [vmem:[#allocation2 + $0x2c] ss:$16 sps:$4 sm:$0x7c]  }
  0xc9   :  { %3618 = vmatpush1.bf16.msra.mxu1 %v5037_v3  ;;  %v5066_v3 = vld [vmem:[%s7124_s0 + $0xa14] ss:$8 sps:$4 sm:$0xff]   ;;  %567 = vst [vmem:[#allocation3 + $0x30] sm:$0xf0] %v552_v30  ;;  %598 = vst [vmem:[#allocation3 + $0x48] sm:$0xf0] %v590_v1 }
  0xca   :  { %3630 = vmatprep.subr.bf16.mxu1 %v5049_v4  ;;  %v423_v4 = vor.u32 %v422_v60, %v419_v59  ;;  %v441_v59 = vshrl.u32 %v5264_v13, 16  ;;  %v444_v60 = vshll.u32 %v5264_v13, 16  ;;  %v5138_v0 = vld [vmem:[%s7124_s0 + $0xad4] ss:$8 sps:$4 sm:$0xff]   ;;  %v5199_v54 = vld [vmem:[%s7124_s0 + $0x464] ss:$8 sps:$4 sm:$0xff]  }
  0xcb   :  { %3915 = vmatpush1.bf16.msra.mxu0 %v5028_v6  ;;  %v5064_v6 = vld [vmem:[%s7124_s0 + $0xa10] ss:$8 sps:$4 sm:$0xff]   ;;  %v5190_v1 = vld [vmem:[%s7124_s0 + $0xb44] ss:$8 sps:$4 sm:$0xff]   ;;  %v5188_v13 = vld [vmem:[%s7124_s0 + $0xb40] ss:$8 sps:$4 sm:$0xff]  }
  0xcc   :  { %3620 = vmatmul.mubr.bf16.vlgmr.msra.gmra.mrb[0].mxu1 %v789_v8  ;;  %3916 = vmatprep.subr.bf16.mxu0 %v5036_v14  ;;  %v5079_v8 = vld [vmem:[%s7124_s0 + $0x340] ss:$8 sps:$4 sm:$0xff]   ;;  %452 = vst [vmem:[#allocation3 + $0xa0] sm:$0xf] %v423_v4  ;;  %v5085_v14 = vld [vmem:[%s7124_s0 + $0x350] ss:$8 sps:$4 sm:$0xff]  }
  0xcd   :  { %3631 = vmatpush1.bf16.msra.mxu1 %v5047_v7  ;;  %v719_v7 = vrot.slane %v717_v2, 7  ;;  %3662 = vmatprep.mubr.bf16.mxu1 %v792_v10  ;;  %v5155_v2 = vld [vmem:[%s7124_s0 + $0x404] ss:$8 sps:$4 sm:$0xff]   ;;  %v446_v30 = vrot.slane %v444_v60, 3  ;;  %v738_v4 = vshrl.u32 %v5266_v61, 16 }
  0xce   :  { %3632 = vmatprep.subr.bf16.mxu1 %v5063_v9  ;;  %v5087_v9 = vld [vmem:[%s7124_s0 + $0x354] ss:$8 sps:$4 sm:$0xff]   ;;  %v5211_v60 = vld [vmem:[%s7124_s0 + $0x484] ss:$8 sps:$4 sm:$0xff]  }
  0xcf   :  { %3917 = vmatpush1.bf16.msra.mxu0 %v5034_v17  ;;  %v720_v11 = vor.u32 %v719_v7, %v716_v5  ;;  %v5093_v17 = vld [vmem:[%s7124_s0 + $0x364] ss:$8 sps:$4 sm:$0xff]   ;;  %v741_v5 = vshll.u32 %v5266_v61, 16  ;;  %v5272_v7 = vld [vmem:[#allocation2 + $0x20] ss:$16 sps:$4 sm:$0x1e]  }
  0xd0   :  { %3918 = vmatprep.subr.bf16.mxu0 %v5042_v21  ;;  %v5099_v21 = vld [vmem:[%s7124_s0 + $0x374] ss:$8 sps:$4 sm:$0xff]  }
  0xd1   :  { %3633 = vmatpush1.bf16.msra.mxu1 %v5061_v15  ;;  %749 = vst [vmem:[#allocation3 + $0xa0] sm:$0xf0] %v720_v11  ;;  %v806_v15 = vld [vmem:[#allocation3 + $0xa8] sm:$0xff]  ;;  %v743_v10 = vrot.slane %v741_v5, 7  ;;  %v5196_v61 = vld [vmem:[%s7124_s0 + $0xb54] ss:$8 sps:$4 sm:$0xff]  }
  0xd2   :  { %3634 = vmatprep.subr.bf16.mxu1 %v5069_v18  ;;  %v5078_v18 = vld [vmem:[%s7124_s0 + $0xa34] ss:$8 sps:$4 sm:$0xff]   ;;  %v5273_v11 = vld [vmem:[#allocation2 + $0x8] ss:$16 sps:$4 sm:$0x7c]  }
  0xd3   :  { %3919 = vmatpush1.bf16.msra.mxu0 %v5040_v34  ;;  %v5117_v34 = vld [vmem:[%s7124_s0 + $0x3a4] ss:$8 sps:$4 sm:$0xff]   ;;  %v5208_v5 = vld [vmem:[%s7124_s0 + $0xb74] ss:$8 sps:$4 sm:$0xff]  }
  0xd4   :  { %3931 = vmatprep.subr.bf16.mxu0 %v5056_v39  ;;  %v5106_v39 = vld [vmem:[%s7124_s0 + $0xa80] ss:$8 sps:$4 sm:$0xff]  }
  0xd5   :  { %3635 = vmatpush1.bf16.msra.mxu1 %v5067_v35  ;;  %v5102_v35 = vld [vmem:[%s7124_s0 + $0xa74] ss:$8 sps:$4 sm:$0xff]  }
  0xd6   :  { %3636 = vmatprep.subr.bf16.mxu1 %v5075_v36  ;;  %3921 = vmatmul.mubr.bf16.vlgmr.msra.gmra.mrb[0].mxu0 %v803_v62  ;;  %v5100_v36 = vld [vmem:[%s7124_s0 + $0xa70] ss:$8 sps:$4 sm:$0xff]   ;;  %v5130_v62 = vld [vmem:[%s7124_s0 + $0xac0] ss:$8 sps:$4 sm:$0xff]  }
  0xd7   :  { %3932 = vmatpush1.bf16.msra.mxu0 %v5054_v55  ;;  %3963 = vmatprep.mubr.bf16.mxu0 %v806_v15  ;;  %v5124_v55 = vld [vmem:[%s7124_s0 + $0xab0] ss:$8 sps:$4 sm:$0xff]   ;;  %v589_v15 = vrot.slane %v5272_v7, 5  ;;  %v5221_v7 = vld [vmem:[%s7124_s0 + $0x4a0] ss:$8 sps:$4 sm:$0xff]  }
  0xd8   :  { %3933 = vmatprep.subr.bf16.mxu0 %v5066_v3  ;;  %v443_v3 = vrot.slane %v441_v59, 2  ;;  %v5203_v59 = vld [vmem:[%s7124_s0 + $0x470] ss:$8 sps:$4 sm:$0xff]  }
  0xd9   :  { %3637 = vmatpush1.bf16.msra.mxu1 %v5073_v56  ;;  %v5147_v56 = vld [vmem:[%s7124_s0 + $0x3f4] ss:$8 sps:$4 sm:$0xff]   ;;  %597 = vst [vmem:[#allocation3 + $0x40] sm:$0xf0] %v589_v15  ;;  %v5235_v15 = vld [vmem:[%s7124_s0 + $0x4c4] ss:$8 sps:$4 sm:$0xff]  }
  0xda   :  { %3638 = vmatprep.subr.bf16.mxu1 %v5081_v63  ;;  %v5145_v63 = vld [vmem:[%s7124_s0 + $0x3f0] ss:$8 sps:$4 sm:$0xff]  }
  0xdb   :  { %3934 = vmatpush1.bf16.msra.mxu0 %v5064_v6  ;;  %v5271_v6 = vld [vmem:[#allocation2] ss:$16 sps:$4 sm:$0x1e]  }
  0xdc   :  { %3935 = vmatprep.subr.bf16.mxu0 %v5072_v12  ;;  %v5136_v12 = vld [vmem:[%s7124_s0 + $0xad0] ss:$8 sps:$4 sm:$0xff]  }
  0xdd   :  { %3639 = vmatpush1.bf16.msra.mxu1 %v5079_v8  ;;  %v447_v8 = vor.u32 %v446_v30, %v443_v3  ;;  %v5200_v3 = vld [vmem:[%s7124_s0 + $0xb60] ss:$8 sps:$4 sm:$0xff]   ;;  %v5215_v30 = vld [vmem:[%s7124_s0 + $0x490] ss:$8 sps:$4 sm:$0xff]  }
  0xde   :  { %3640 = vmatprep.subr.bf16.mxu1 %v5087_v9  ;;  %v740_v9 = vrot.slane %v738_v4, 6  ;;  %v5223_v4 = vld [vmem:[%s7124_s0 + $0x4a4] ss:$8 sps:$4 sm:$0xff]  }
  0xdf   :  { %3936 = vmatpush1.bf16.msra.mxu0 %v5070_v16  ;;  %v5274_v16 = vld [vmem:[#allocation2 + $0x28] ss:$16 sps:$4 sm:$0x7c]   ;;  %455 = vst [vmem:[#allocation3 + $0xb8] sm:$0xf] %v447_v8 }
  0xe0   :  { %3937 = vmatprep.subr.bf16.mxu0 %v5078_v18  ;;  %v791_v18 = vld [vmem:[#allocation3 + $0x30] sm:$0xff] }
  0xe1   :  { %3641 = vmatpush1.bf16.msra.mxu1 %v5085_v14  ;;  %v292_v14 = vrot.slane %v5271_v6, 1  ;;  %v5206_v6 = vld [vmem:[%s7124_s0 + $0xb70] ss:$8 sps:$4 sm:$0xff]   ;;  %v5229_v8 = vld [vmem:[%s7124_s0 + $0x4b4] ss:$8 sps:$4 sm:$0xff]  }
  0xe2   :  { %3642 = vmatprep.subr.bf16.mxu1 %v5093_v17  ;;  %v5153_v17 = vld [vmem:[%s7124_s0 + $0x400] ss:$8 sps:$4 sm:$0xff]  }
  0xe3   :  { %3938 = vmatpush1.bf16.msra.mxu0 %v5076_v19  ;;  %v744_v19 = vor.u32 %v743_v10, %v740_v9  ;;  %300 = vst [vmem:[#allocation3 + $0x40] sm:$0xf] %v292_v14  ;;  %v5214_v9 = vld [vmem:[%s7124_s0 + $0xb84] ss:$8 sps:$4 sm:$0xff]   ;;  %v5212_v14 = vld [vmem:[%s7124_s0 + $0xb80] ss:$8 sps:$4 sm:$0xff]  }
  0xe4   :  { %3939 = vmatprep.subr.bf16.mxu0 %v5084_v22  ;;  %v5169_v22 = vld [vmem:[%s7124_s0 + $0x414] ss:$8 sps:$4 sm:$0xff]  }
  0xe5   :  { %3643 = vmatpush1.bf16.msra.mxu1 %v5091_v20  ;;  %v433_v20 = vshrl.u32 %v5273_v11, 16  ;;  %752 = vst [vmem:[#allocation3 + $0xb8] sm:$0xf0] %v744_v19  ;;  %v5365_v10 = vld [vmem:[#allocation2 + $0xc] ss:$16 sps:$4 sm:$0x1e]  }
  0xe6   :  { %3644 = vmatprep.subr.bf16.mxu1 %v5099_v21  ;;  %v436_v21 = vshll.u32 %v5273_v11, 16  ;;  %v5227_v11 = vld [vmem:[%s7124_s0 + $0x4b0] ss:$8 sps:$4 sm:$0xff]   ;;  %v5220_v19 = vld [vmem:[%s7124_s0 + $0xb94] ss:$8 sps:$4 sm:$0xff]  }
  0xe7   :  { %3940 = vmatpush1.bf16.msra.mxu0 %v5082_v23  ;;  %v794_v23 = vld [vmem:[#allocation3 + $0x48] sm:$0xff] }
  0xe8   :  { %3941 = vmatprep.subr.bf16.mxu0 %v5090_v26  ;;  %v5144_v26 = vld [vmem:[%s7124_s0 + $0xae4] ss:$8 sps:$4 sm:$0xff]  }
  0xe9   :  { %3645 = vmatpush1.bf16.msra.mxu1 %v5097_v24  ;;  %v730_v24 = vshrl.u32 %v5274_v16, 16 }
  0xea   :  { %3646 = vmatprep.subr.bf16.mxu1 %v5105_v25  ;;  %v733_v25 = vshll.u32 %v5274_v16, 16  ;;  %v295_v16 = vrot.slane %v5365_v10, 1  ;;  %v5290_v10 = vld [vmem:[%s7124_s0 + $0xc30] ss:$8 sps:$4 sm:$0xff]  }
  0xeb   :  { %3942 = vmatpush1.bf16.msra.mxu0 %v5088_v27  ;;  %v435_v27 = vrot.slane %v433_v20, 2 }
  0xec   :  { %3943 = vmatprep.subr.bf16.mxu0 %v5096_v31  ;;  %v735_v31 = vrot.slane %v733_v25, 7  ;;  %303 = vst [vmem:[#allocation3 + $0x58] sm:$0xf] %v295_v16  ;;  %v5296_v16 = vld [vmem:[%s7124_s0 + $0xc40] ss:$8 sps:$4 sm:$0xff]  }
  0xed   :  { %3647 = vmatpush1.bf16.msra.mxu1 %v5103_v28  ;;  %v438_v28 = vrot.slane %v436_v21, 3  ;;  %v5374_v21 = vld [vmem:[#allocation2 + $0x24] ss:$16 sps:$4 sm:$0x78]  }
  0xee   :  { %3648 = vmatprep.subr.bf16.mxu1 %v5111_v29  ;;  %v732_v29 = vrot.slane %v730_v24, 6  ;;  %v5379_v24 = vld [vmem:[#allocation2 + $0x8] ss:$16 sps:$4 sm:$0x1e]   ;;  %v774_v25 = vrot.slane %v5374_v21, 7 }
  0xef   :  { %3944 = vmatpush1.bf16.msra.mxu0 %v5094_v32  ;;  %v5167_v32 = vld [vmem:[%s7124_s0 + $0x410] ss:$8 sps:$4 sm:$0xff]  }
  0xf0   :  { %3945 = vmatprep.subr.bf16.mxu0 %v5102_v35  ;;  %v5175_v35 = vld [vmem:[%s7124_s0 + $0x424] ss:$8 sps:$4 sm:$0xff]   ;;  %782 = vst [vmem:[#allocation3 + $0xc8] sm:$0xf0] %v774_v25  ;;  %v5302_v25 = vld [vmem:[%s7124_s0 + $0xc50] ss:$8 sps:$4 sm:$0xff]  }
  0xf1   :  { %3649 = vmatpush1.bf16.msra.mxu1 %v5109_v33  ;;  %v439_v33 = vor.u32 %v438_v28, %v435_v27  ;;  %v5241_v27 = vld [vmem:[%s7124_s0 + $0x4d4] ss:$8 sps:$4 sm:$0xff]   ;;  %v294_v28 = vrot.slane %v5379_v24, 1 }
  0xf2   :  { %3650 = vmatprep.subr.bf16.mxu1 %v5117_v34  ;;  %v5142_v34 = vld [vmem:[%s7124_s0 + $0xae0] ss:$8 sps:$4 sm:$0xff]   ;;  %v5477_v24 = vld [vmem:[#allocation2 + $0xc] ss:$16 sps:$4 sm:$0x78]  }
  0xf3   :  { %3946 = vmatpush1.bf16.msra.mxu0 %v5100_v36  ;;  %v736_v36 = vor.u32 %v735_v31, %v732_v29  ;;  %454 = vst [vmem:[#allocation3 + $0xb0] sm:$0xf] %v439_v33  ;;  %v5381_v29 = vld [vmem:[#allocation2] ss:$16 sps:$4 sm:$0x78]  }
  0xf4   :  { %3947 = vmatprep.subr.bf16.mxu0 %v5108_v40  ;;  %v5148_v40 = vld [vmem:[%s7124_s0 + $0xaf0] ss:$8 sps:$4 sm:$0xff]   ;;  %v5226_v31 = vld [vmem:[%s7124_s0 + $0xba4] ss:$8 sps:$4 sm:$0xff]   ;;  %302 = vst [vmem:[#allocation3 + $0x50] sm:$0xf] %v294_v28 }
  0xf5   :  { %3651 = vmatpush1.bf16.msra.mxu1 %v5115_v38  ;;  %v5150_v38 = vld [vmem:[%s7124_s0 + $0xaf4] ss:$8 sps:$4 sm:$0xff]   ;;  %751 = vst [vmem:[#allocation3 + $0xb0] sm:$0xf0] %v736_v36 }
  0xf6   :  { %3652 = vmatprep.subr.bf16.mxu1 %v5123_v37  ;;  %v5173_v37 = vld [vmem:[%s7124_s0 + $0x420] ss:$8 sps:$4 sm:$0xff]  }
  0xf7   :  { %3948 = vmatpush1.bf16.msra.mxu0 %v5106_v39  ;;  %v5181_v39 = vld [vmem:[%s7124_s0 + $0x434] ss:$8 sps:$4 sm:$0xff]   ;;  %v5382_v33 = vld [vmem:[#allocation2 + $0x20] ss:$16 sps:$4 sm:$0x78]  }
  0xf8   :  { %3949 = vmatprep.subr.bf16.mxu0 %v5114_v43  ;;  %v5179_v43 = vld [vmem:[%s7124_s0 + $0x430] ss:$8 sps:$4 sm:$0xff]   ;;  %v773_v36 = vrot.slane %v5382_v33, 7  ;;  %v479_v33 = vrot.slane %v5477_v24, 3  ;;  %v5358_v24 = vld [vmem:[%s7124_s0 + $0xce4] ss:$8 sps:$4 sm:$0xff]  }
  0xf9   :  { %3653 = vmatpush1.bf16.msra.mxu1 %v5121_v41  ;;  %v5162_v41 = vld [vmem:[%s7124_s0 + $0xb04] ss:$8 sps:$4 sm:$0xff]  }
  0xfa   :  { %3654 = vmatprep.subr.bf16.mxu1 %v5129_v42  ;;  %v5160_v42 = vld [vmem:[%s7124_s0 + $0xb00] ss:$8 sps:$4 sm:$0xff]   ;;  %781 = vst [vmem:[#allocation3 + $0xc0] sm:$0xf0] %v773_v36  ;;  %487 = vst [vmem:[#allocation3 + $0xd8] sm:$0xf] %v479_v33 }
  0xfb   :  { %3950 = vmatpush1.bf16.msra.mxu0 %v5112_v44  ;;  %v5187_v44 = vld [vmem:[%s7124_s0 + $0x444] ss:$8 sps:$4 sm:$0xff]  }
  0xfc   :  { %3951 = vmatprep.subr.bf16.mxu0 %v5120_v47  ;;  %v5170_v47 = vld [vmem:[%s7124_s0 + $0xb10] ss:$8 sps:$4 sm:$0xff]   ;;  %v5378_v33 = vld [vmem:[%s7124_s0 + $0xd04] ss:$8 sps:$4 sm:$0xff]  }
  0xfd   :  { %3655 = vmatpush1.bf16.msra.mxu1 %v5127_v45  ;;  %v805_v45 = vld [vmem:[#allocation3 + $0xa0] sm:$0xff] }
  0xfe   :  { %3656 = vmatprep.subr.bf16.mxu1 %v5135_v46  ;;  %v5172_v46 = vld [vmem:[%s7124_s0 + $0xb14] ss:$8 sps:$4 sm:$0xff]  }
  0xff   :  { %3952 = vmatpush1.bf16.msra.mxu0 %v5118_v49  ;;  %v808_v49 = vld [vmem:[#allocation3 + $0xb8] sm:$0xff] }
 0x100   :  { %3953 = vmatprep.subr.bf16.mxu0 %v5126_v52  ;;  %v5178_v52 = vld [vmem:[%s7124_s0 + $0xb24] ss:$8 sps:$4 sm:$0xff]  }
 0x101   :  { %3657 = vmatpush1.bf16.msra.mxu1 %v5133_v50  ;;  %v5185_v50 = vld [vmem:[%s7124_s0 + $0x440] ss:$8 sps:$4 sm:$0xff]  }
 0x102   :  { %3658 = vmatprep.subr.bf16.mxu1 %v5141_v51  ;;  %v5193_v51 = vld [vmem:[%s7124_s0 + $0x454] ss:$8 sps:$4 sm:$0xff]  }
 0x103   :  { %3954 = vmatpush1.bf16.msra.mxu0 %v5124_v55  ;;  %v5184_v55 = vld [vmem:[%s7124_s0 + $0xb34] ss:$8 sps:$4 sm:$0xff]  }
 0x104   :  { %3955 = vmatprep.subr.bf16.mxu0 %v5132_v58  ;;  %v5205_v58 = vld [vmem:[%s7124_s0 + $0x474] ss:$8 sps:$4 sm:$0xff]  }
 0x105   :  { %3659 = vmatpush1.bf16.msra.mxu1 %v5139_v48  ;;  %v5191_v48 = vld [vmem:[%s7124_s0 + $0x450] ss:$8 sps:$4 sm:$0xff]  }
 0x106   :  { %3660 = vmatprep.subr.bf16.mxu1 %v5147_v56  ;;  %v5182_v56 = vld [vmem:[%s7124_s0 + $0xb30] ss:$8 sps:$4 sm:$0xff]  }
 0x107   :  { %3956 = vmatpush1.bf16.msra.mxu0 %v5130_v62  ;;  %v5194_v62 = vld [vmem:[%s7124_s0 + $0xb50] ss:$8 sps:$4 sm:$0xff]  }
 0x108   :  { %3957 = vmatprep.subr.bf16.mxu0 %v5138_v0  ;;  %v5217_v0 = vld [vmem:[%s7124_s0 + $0x494] ss:$8 sps:$4 sm:$0xff]  }
 0x109   :  { %3661 = vmatpush1.bf16.msra.mxu1 %v5145_v63  ;;  %v5209_v63 = vld [vmem:[%s7124_s0 + $0x480] ss:$8 sps:$4 sm:$0xff]  }
 0x10a   :  { %3673 = vmatprep.subr.bf16.mxu1 %v5155_v2  ;;  %v5202_v2 = vld [vmem:[%s7124_s0 + $0xb64] ss:$8 sps:$4 sm:$0xff]  }
 0x10b   :  { %3958 = vmatpush1.bf16.msra.mxu0 %v5136_v12  ;;  %v5367_v12 = vld [vmem:[#allocation2 + $0x2c] ss:$16 sps:$4 sm:$0x1e]  }
 0x10c   :  { %3663 = vmatmul.mubr.bf16.vlgmr.msra.gmra.mrb[0].mxu1 %v791_v18  ;;  %3959 = vmatprep.subr.bf16.mxu0 %v5144_v26  ;;  %v5372_v18 = vld [vmem:[#allocation2 + $0x4] ss:$16 sps:$4 sm:$0x78]   ;;  %v5380_v26 = vld [vmem:[#allocation2 + $0x28] ss:$16 sps:$4 sm:$0x1e]  }
 0x10d   :  { %3674 = vmatpush1.bf16.msra.mxu1 %v5153_v17  ;;  %3705 = vmatprep.mubr.bf16.mxu1 %v794_v23  ;;  %v592_v17 = vrot.slane %v5367_v12, 5  ;;  %v477_v20 = vrot.slane %v5372_v18, 3  ;;  %v5233_v23 = vld [vmem:[%s7124_s0 + $0x4c0] ss:$8 sps:$4 sm:$0xff]   ;;  %v5313_v12 = vld [vmem:[%s7124_s0 + $0x574] ss:$8 sps:$4 sm:$0xff]  }
 0x10e   :  { %3675 = vmatprep.subr.bf16.mxu1 %v5169_v22  ;;  %v5218_v22 = vld [vmem:[%s7124_s0 + $0xb90] ss:$8 sps:$4 sm:$0xff]   ;;  %v5473_v18 = vld [vmem:[#allocation2 + $0x4] ss:$16 sps:$4 sm:$0x3e]  }
 0x10f   :  { %3960 = vmatpush1.bf16.msra.mxu0 %v5142_v34  ;;  %600 = vst [vmem:[#allocation3 + $0x58] sm:$0xf0] %v592_v17  ;;  %485 = vst [vmem:[#allocation3 + $0xc8] sm:$0xf] %v477_v20  ;;  %v476_v34 = vrot.slane %v5381_v29, 3  ;;  %v333_v20 = vshrl.u32 %v5473_v18, 16 }
 0x110   :  { %3961 = vmatprep.subr.bf16.mxu0 %v5150_v38  ;;  %v5224_v38 = vld [vmem:[%s7124_s0 + $0xba0] ss:$8 sps:$4 sm:$0xff]   ;;  %v5319_v17 = vld [vmem:[%s7124_s0 + $0x584] ss:$8 sps:$4 sm:$0xff]   ;;  %v336_v21 = vshll.u32 %v5473_v18, 16 }
 0x111   :  { %3676 = vmatpush1.bf16.msra.mxu1 %v5167_v32  ;;  %v591_v32 = vrot.slane %v5380_v26, 5  ;;  %484 = vst [vmem:[#allocation3 + $0xc0] sm:$0xf] %v476_v34  ;;  %v5325_v26 = vld [vmem:[%s7124_s0 + $0x594] ss:$8 sps:$4 sm:$0xff]  }
 0x112   :  { %3677 = vmatprep.subr.bf16.mxu1 %v5175_v35  ;;  %v5239_v35 = vld [vmem:[%s7124_s0 + $0x4d0] ss:$8 sps:$4 sm:$0xff]   ;;  %v338_v28 = vrot.slane %v336_v21, 2  ;;  %v5479_v34 = vld [vmem:[#allocation2 + $0x2c] ss:$16 sps:$4 sm:$0x78]  }
 0x113   :  { %3962 = vmatpush1.bf16.msra.mxu0 %v5148_v40  ;;  %599 = vst [vmem:[#allocation3 + $0x50] sm:$0xf0] %v591_v32  ;;  %v5232_v40 = vld [vmem:[%s7124_s0 + $0xbb4] ss:$8 sps:$4 sm:$0xff]   ;;  %v5310_v32 = vld [vmem:[%s7124_s0 + $0xc64] ss:$8 sps:$4 sm:$0xff]  }
 0x114   :  { %3974 = vmatprep.subr.bf16.mxu0 %v5162_v41  ;;  %v5230_v41 = vld [vmem:[%s7124_s0 + $0xbb0] ss:$8 sps:$4 sm:$0xff]   ;;  %v5352_v18 = vld [vmem:[%s7124_s0 + $0xcd4] ss:$8 sps:$4 sm:$0xff]  }
 0x115   :  { %3678 = vmatpush1.bf16.msra.mxu1 %v5173_v37  ;;  %v5247_v37 = vld [vmem:[%s7124_s0 + $0x4e4] ss:$8 sps:$4 sm:$0xff]   ;;  %v5350_v21 = vld [vmem:[%s7124_s0 + $0xcd0] ss:$8 sps:$4 sm:$0xff]  }
 0x116   :  { %3679 = vmatprep.subr.bf16.mxu1 %v5181_v39  ;;  %3964 = vmatmul.mubr.bf16.vlgmr.msra.gmra.mrb[0].mxu0 %v805_v45  ;;  %v5245_v39 = vld [vmem:[%s7124_s0 + $0x4e0] ss:$8 sps:$4 sm:$0xff]   ;;  %v5251_v45 = vld [vmem:[%s7124_s0 + $0x4f0] ss:$8 sps:$4 sm:$0xff]  }
 0x117   :  { %3975 = vmatpush1.bf16.msra.mxu0 %v5160_v42  ;;  %4006 = vmatprep.mubr.bf16.mxu0 %v808_v49  ;;  %v5253_v42 = vld [vmem:[%s7124_s0 + $0x4f4] ss:$8 sps:$4 sm:$0xff]   ;;  %v5242_v49 = vld [vmem:[%s7124_s0 + $0xbd0] ss:$8 sps:$4 sm:$0xff]  }
 0x118   :  { %3976 = vmatprep.subr.bf16.mxu0 %v5172_v46  ;;  %v5263_v46 = vld [vmem:[%s7124_s0 + $0x504] ss:$8 sps:$4 sm:$0xff]  }
 0x119   :  { %3680 = vmatpush1.bf16.msra.mxu1 %v5179_v43  ;;  %v5238_v43 = vld [vmem:[%s7124_s0 + $0xbc4] ss:$8 sps:$4 sm:$0xff]  }
 0x11a   :  { %3681 = vmatprep.subr.bf16.mxu1 %v5187_v44  ;;  %v5236_v44 = vld [vmem:[%s7124_s0 + $0xbc0] ss:$8 sps:$4 sm:$0xff]  }
 0x11b   :  { %3977 = vmatpush1.bf16.msra.mxu0 %v5170_v47  ;;  %v5244_v47 = vld [vmem:[%s7124_s0 + $0xbd4] ss:$8 sps:$4 sm:$0xff]  }
 0x11c   :  { %3978 = vmatprep.subr.bf16.mxu0 %v5178_v52  ;;  %v793_v52 = vld [vmem:[#allocation3 + $0x40] sm:$0xff] }
 0x11d   :  { %3682 = vmatpush1.bf16.msra.mxu1 %v5185_v50  ;;  %v5261_v50 = vld [vmem:[%s7124_s0 + $0x500] ss:$8 sps:$4 sm:$0xff]  }
 0x11e   :  { %3683 = vmatprep.subr.bf16.mxu1 %v5193_v51  ;;  %v5277_v51 = vld [vmem:[%s7124_s0 + $0x514] ss:$8 sps:$4 sm:$0xff]  }
 0x11f   :  { %3979 = vmatpush1.bf16.msra.mxu0 %v5176_v53  ;;  %v796_v53 = vld [vmem:[#allocation3 + $0x58] sm:$0xff] }
 0x120   :  { %3980 = vmatprep.subr.bf16.mxu0 %v5184_v55  ;;  %v5275_v55 = vld [vmem:[%s7124_s0 + $0x510] ss:$8 sps:$4 sm:$0xff]  }
 0x121   :  { %3684 = vmatpush1.bf16.msra.mxu1 %v5191_v48  ;;  %v5250_v48 = vld [vmem:[%s7124_s0 + $0xbe4] ss:$8 sps:$4 sm:$0xff]  }
 0x122   :  { %3685 = vmatprep.subr.bf16.mxu1 %v5199_v54  ;;  %v5248_v54 = vld [vmem:[%s7124_s0 + $0xbe0] ss:$8 sps:$4 sm:$0xff]  }
 0x123   :  { %3981 = vmatpush1.bf16.msra.mxu0 %v5182_v56  ;;  %v5283_v56 = vld [vmem:[%s7124_s0 + $0x524] ss:$8 sps:$4 sm:$0xff]  }
 0x124   :  { %3982 = vmatprep.subr.bf16.mxu0 %v5190_v1  ;;  %v5281_v1 = vld [vmem:[%s7124_s0 + $0x520] ss:$8 sps:$4 sm:$0xff]  }
 0x125   :  { %3686 = vmatpush1.bf16.msra.mxu1 %v5197_v57  ;;  %v5256_v57 = vld [vmem:[%s7124_s0 + $0xbf4] ss:$8 sps:$4 sm:$0xff]  }
 0x126   :  { %3687 = vmatprep.subr.bf16.mxu1 %v5205_v58  ;;  %v5254_v58 = vld [vmem:[%s7124_s0 + $0xbf0] ss:$8 sps:$4 sm:$0xff]  }
 0x127   :  { %3983 = vmatpush1.bf16.msra.mxu0 %v5188_v13  ;;  %v5289_v13 = vld [vmem:[%s7124_s0 + $0x534] ss:$8 sps:$4 sm:$0xff]  }
 0x128   :  { %3984 = vmatprep.subr.bf16.mxu0 %v5196_v61  ;;  %v5287_v61 = vld [vmem:[%s7124_s0 + $0x530] ss:$8 sps:$4 sm:$0xff]  }
 0x129   :  { %3688 = vmatpush1.bf16.msra.mxu1 %v5203_v59  ;;  %v5270_v59 = vld [vmem:[%s7124_s0 + $0xc04] ss:$8 sps:$4 sm:$0xff]  }
 0x12a   :  { %3689 = vmatprep.subr.bf16.mxu1 %v5211_v60  ;;  %v5268_v60 = vld [vmem:[%s7124_s0 + $0xc00] ss:$8 sps:$4 sm:$0xff]  }
 0x12b   :  { %3985 = vmatpush1.bf16.msra.mxu0 %v5194_v62  ;;  %v5295_v62 = vld [vmem:[%s7124_s0 + $0x544] ss:$8 sps:$4 sm:$0xff]  }
 0x12c   :  { %3986 = vmatprep.subr.bf16.mxu0 %v5202_v2  ;;  %v5278_v2 = vld [vmem:[%s7124_s0 + $0xc10] ss:$8 sps:$4 sm:$0xff]  }
 0x12d   :  { %3690 = vmatpush1.bf16.msra.mxu1 %v5209_v63  ;;  %v807_v63 = vld [vmem:[#allocation3 + $0xb0] sm:$0xff] }
 0x12e   :  { %3691 = vmatprep.subr.bf16.mxu1 %v5217_v0  ;;  %v5280_v0 = vld [vmem:[%s7124_s0 + $0xc14] ss:$8 sps:$4 sm:$0xff]  }
 0x12f   :  { %3987 = vmatpush1.bf16.msra.mxu0 %v5200_v3  ;;  %v810_v3 = vld [vmem:[#allocation3 + $0xc8] sm:$0xff] }
 0x130   :  { %3988 = vmatprep.subr.bf16.mxu0 %v5208_v5  ;;  %v5286_v5 = vld [vmem:[%s7124_s0 + $0xc24] ss:$8 sps:$4 sm:$0xff]  }
 0x131   :  { %3692 = vmatpush1.bf16.msra.mxu1 %v5215_v30  ;;  %v5293_v30 = vld [vmem:[%s7124_s0 + $0x540] ss:$8 sps:$4 sm:$0xff]  }
 0x132   :  { %3693 = vmatprep.subr.bf16.mxu1 %v5223_v4  ;;  %v5301_v4 = vld [vmem:[%s7124_s0 + $0x554] ss:$8 sps:$4 sm:$0xff]  }
 0x133   :  { %3989 = vmatpush1.bf16.msra.mxu0 %v5206_v6  ;;  %v5284_v6 = vld [vmem:[%s7124_s0 + $0xc20] ss:$8 sps:$4 sm:$0xff]  }
 0x134   :  { %3990 = vmatprep.subr.bf16.mxu0 %v5214_v9  ;;  %v5292_v9 = vld [vmem:[%s7124_s0 + $0xc34] ss:$8 sps:$4 sm:$0xff]  }
 0x135   :  { %3694 = vmatpush1.bf16.msra.mxu1 %v5221_v7  ;;  %v5299_v7 = vld [vmem:[%s7124_s0 + $0x550] ss:$8 sps:$4 sm:$0xff]  }
 0x136   :  { %3695 = vmatprep.subr.bf16.mxu1 %v5229_v8  ;;  %v5307_v8 = vld [vmem:[%s7124_s0 + $0x564] ss:$8 sps:$4 sm:$0xff]  }
 0x137   :  { %3991 = vmatpush1.bf16.msra.mxu0 %v5212_v14  ;;  %v5298_v14 = vld [vmem:[%s7124_s0 + $0xc44] ss:$8 sps:$4 sm:$0xff]  }
 0x138   :  { %3992 = vmatprep.subr.bf16.mxu0 %v5220_v19  ;;  %v5304_v19 = vld [vmem:[%s7124_s0 + $0xc54] ss:$8 sps:$4 sm:$0xff]  }
 0x139   :  { %3696 = vmatpush1.bf16.msra.mxu1 %v5227_v11  ;;  %v5305_v11 = vld [vmem:[%s7124_s0 + $0x560] ss:$8 sps:$4 sm:$0xff]  }
 0x13a   :  { %3697 = vmatprep.subr.bf16.mxu1 %v5235_v15  ;;  %v5311_v15 = vld [vmem:[%s7124_s0 + $0x570] ss:$8 sps:$4 sm:$0xff]  }
 0x13b   :  { %3993 = vmatpush1.bf16.msra.mxu0 %v5218_v22  ;;  %v5475_v22 = vld [vmem:[#allocation2 + $0x24] ss:$16 sps:$4 sm:$0x3e]  }
 0x13c   :  { %3994 = vmatprep.subr.bf16.mxu0 %v5226_v31  ;;  %v630_v29 = vshrl.u32 %v5475_v22, 16  ;;  %v633_v31 = vshll.u32 %v5475_v22, 16  ;;  %v5385_v22 = vld [vmem:[%s7124_s0 + $0x614] ss:$8 sps:$4 sm:$0xff]  }
 0x13d   :  { %3698 = vmatpush1.bf16.msra.mxu1 %v5233_v23  ;;  %v5317_v23 = vld [vmem:[%s7124_s0 + $0x580] ss:$8 sps:$4 sm:$0xff]  }
 0x13e   :  { %3699 = vmatprep.subr.bf16.mxu1 %v5241_v27  ;;  %v335_v27 = vrot.slane %v333_v20, 1  ;;  %v632_v36 = vrot.slane %v630_v29, 5  ;;  %v795_v20 = vld [vmem:[#allocation3 + $0x50] sm:$0xff]  ;;  %v5389_v29 = vld [vmem:[%s7124_s0 + $0x620] ss:$8 sps:$4 sm:$0xff]  }
 0x13f   :  { %3995 = vmatpush1.bf16.msra.mxu0 %v5224_v38  ;;  %v635_v38 = vrot.slane %v633_v31, 6  ;;  %v5362_v31 = vld [vmem:[%s7124_s0 + $0xcf0] ss:$8 sps:$4 sm:$0xff]  }
 0x140   :  { %3996 = vmatprep.subr.bf16.mxu0 %v5232_v40  ;;  %v5323_v40 = vld [vmem:[%s7124_s0 + $0x590] ss:$8 sps:$4 sm:$0xff]  }
 0x141   :  { %3700 = vmatpush1.bf16.msra.mxu1 %v5239_v35  ;;  %v339_v35 = vor.u32 %v338_v28, %v335_v27  ;;  %v5391_v27 = vld [vmem:[%s7124_s0 + $0x624] ss:$8 sps:$4 sm:$0xff]   ;;  %v5364_v28 = vld [vmem:[%s7124_s0 + $0xcf4] ss:$8 sps:$4 sm:$0xff]  }
 0x142   :  { %3701 = vmatprep.subr.bf16.mxu1 %v5247_v37  ;;  %v5481_v37 = vld [vmem:[#allocation2] ss:$16 sps:$4 sm:$0x3e]  }
 0x143   :  { %3997 = vmatpush1.bf16.msra.mxu0 %v5230_v41  ;;  %v5482_v41 = vld [vmem:[#allocation2 + $0x20] ss:$16 sps:$4 sm:$0x3e]   ;;  %361 = vst [vmem:[#allocation3 + $0x68] sm:$0xf] %v339_v35 }
 0x144   :  { %3998 = vmatprep.subr.bf16.mxu0 %v5238_v43  ;;  %v636_v43 = vor.u32 %v635_v38, %v632_v36  ;;  %v5376_v35 = vld [vmem:[%s7124_s0 + $0xd00] ss:$8 sps:$4 sm:$0xff]   ;;  %v5403_v38 = vld [vmem:[%s7124_s0 + $0x644] ss:$8 sps:$4 sm:$0xff]  }
 0x145   :  { %3702 = vmatpush1.bf16.msra.mxu1 %v5245_v39  ;;  %v776_v39 = vrot.slane %v5479_v34, 7  ;;  %v5395_v34 = vld [vmem:[%s7124_s0 + $0x630] ss:$8 sps:$4 sm:$0xff]   ;;  %v809_v36 = vld [vmem:[#allocation3 + $0xc0] sm:$0xff] }
 0x146   :  { %3703 = vmatprep.subr.bf16.mxu1 %v5253_v42  ;;  %v5308_v42 = vld [vmem:[%s7124_s0 + $0xc60] ss:$8 sps:$4 sm:$0xff]   ;;  %658 = vst [vmem:[#allocation3 + $0x68] sm:$0xf0] %v636_v43  ;;  %v5394_v43 = vld [vmem:[%s7124_s0 + $0xd24] ss:$8 sps:$4 sm:$0xff]  }
 0x147   :  { %3999 = vmatpush1.bf16.msra.mxu0 %v5236_v44  ;;  %v325_v44 = vshrl.u32 %v5481_v37, 16  ;;  %784 = vst [vmem:[#allocation3 + $0xd8] sm:$0xf0] %v776_v39  ;;  %v5401_v39 = vld [vmem:[%s7124_s0 + $0x640] ss:$8 sps:$4 sm:$0xff]  }
 0x148   :  { %4000 = vmatprep.subr.bf16.mxu0 %v5244_v47  ;;  %v622_v47 = vshrl.u32 %v5482_v41, 16 }
 0x149   :  { %3704 = vmatpush1.bf16.msra.mxu1 %v5251_v45  ;;  %v328_v45 = vshll.u32 %v5481_v37, 16  ;;  %v5388_v37 = vld [vmem:[%s7124_s0 + $0xd14] ss:$8 sps:$4 sm:$0xff]  }
 0x14a   :  { %3716 = vmatprep.subr.bf16.mxu1 %v5263_v46  ;;  %v5483_v46 = vld [vmem:[#allocation2 + $0x8] ss:$16 sps:$4 sm:$0x78]  }
 0x14b   :  { %4001 = vmatpush1.bf16.msra.mxu0 %v5242_v49  ;;  %v625_v49 = vshll.u32 %v5482_v41, 16  ;;  %v5386_v41 = vld [vmem:[%s7124_s0 + $0xd10] ss:$8 sps:$4 sm:$0xff]  }
 0x14c   :  { %3706 = vmatmul.mubr.bf16.vlgmr.msra.gmra.mrb[0].mxu1 %v793_v52  ;;  %4002 = vmatprep.subr.bf16.mxu0 %v5250_v48  ;;  %v327_v52 = vrot.slane %v325_v44, 1  ;;  %v478_v48 = vrot.slane %v5483_v46, 3  ;;  %v5407_v44 = vld [vmem:[%s7124_s0 + $0x650] ss:$8 sps:$4 sm:$0xff]   ;;  %v5415_v46 = vld [vmem:[%s7124_s0 + $0x664] ss:$8 sps:$4 sm:$0xff]  }
 0x14d   :  { %3717 = vmatpush1.bf16.msra.mxu1 %v5261_v50  ;;  %3748 = vmatprep.mubr.bf16.mxu1 %v796_v53  ;;  %v5484_v50 = vld [vmem:[#allocation2 + $0x28] ss:$16 sps:$4 sm:$0x78]   ;;  %v330_v53 = vrot.slane %v328_v45, 2 }
 0x14e   :  { %3718 = vmatprep.subr.bf16.mxu1 %v5277_v51  ;;  %v5331_v51 = vld [vmem:[%s7124_s0 + $0x5a4] ss:$8 sps:$4 sm:$0xff]   ;;  %486 = vst [vmem:[#allocation3 + $0xd0] sm:$0xf] %v478_v48  ;;  %v5392_v45 = vld [vmem:[%s7124_s0 + $0xd20] ss:$8 sps:$4 sm:$0xff]  }
 0x14f   :  { %4003 = vmatpush1.bf16.msra.mxu0 %v5248_v54  ;;  %v5316_v54 = vld [vmem:[%s7124_s0 + $0xc74] ss:$8 sps:$4 sm:$0xff]   ;;  %v5404_v48 = vld [vmem:[%s7124_s0 + $0xd40] ss:$8 sps:$4 sm:$0xff]  }
 0x150   :  { %4004 = vmatprep.subr.bf16.mxu0 %v5256_v57  ;;  %v775_v57 = vrot.slane %v5484_v50, 7  ;;  %v5398_v50 = vld [vmem:[%s7124_s0 + $0xd30] ss:$8 sps:$4 sm:$0xff]  }
 0x151   :  { %3719 = vmatpush1.bf16.msra.mxu1 %v5275_v55  ;;  %v624_v55 = vrot.slane %v622_v47, 5  ;;  %v5400_v47 = vld [vmem:[%s7124_s0 + $0xd34] ss:$8 sps:$4 sm:$0xff]  }
 0x152   :  { %3720 = vmatprep.subr.bf16.mxu1 %v5283_v56  ;;  %v627_v56 = vrot.slane %v625_v49, 6  ;;  %783 = vst [vmem:[#allocation3 + $0xd0] sm:$0xf0] %v775_v57  ;;  %v5413_v49 = vld [vmem:[%s7124_s0 + $0x660] ss:$8 sps:$4 sm:$0xff]  }
 0x153   :  { %4005 = vmatpush1.bf16.msra.mxu0 %v5254_v58  ;;  %v331_v58 = vor.u32 %v330_v53, %v327_v52  ;;  %v5406_v52 = vld [vmem:[%s7124_s0 + $0xd44] ss:$8 sps:$4 sm:$0xff]   ;;  %v5419_v53 = vld [vmem:[%s7124_s0 + $0x670] ss:$8 sps:$4 sm:$0xff]  }
 0x154   :  { %4017 = vmatprep.subr.bf16.mxu0 %v5270_v59  ;;  %v5314_v59 = vld [vmem:[%s7124_s0 + $0xc70] ss:$8 sps:$4 sm:$0xff]  }
 0x155   :  { %3721 = vmatpush1.bf16.msra.mxu1 %v5281_v1  ;;  %v5329_v1 = vld [vmem:[%s7124_s0 + $0x5a0] ss:$8 sps:$4 sm:$0xff]   ;;  %360 = vst [vmem:[#allocation3 + $0x60] sm:$0xf] %v331_v58  ;;  %v5410_v57 = vld [vmem:[%s7124_s0 + $0xd50] ss:$8 sps:$4 sm:$0xff]  }
 0x156   :  { %3722 = vmatprep.subr.bf16.mxu1 %v5289_v13  ;;  %4007 = vmatmul.mubr.bf16.vlgmr.msra.gmra.mrb[0].mxu0 %v807_v63  ;;  %v628_v13 = vor.u32 %v627_v56, %v624_v55  ;;  %v5320_v63 = vld [vmem:[%s7124_s0 + $0xc80] ss:$8 sps:$4 sm:$0xff]   ;;  %v5412_v55 = vld [vmem:[%s7124_s0 + $0xd54] ss:$8 sps:$4 sm:$0xff]  }
 0x157   :  { %4018 = vmatpush1.bf16.msra.mxu0 %v5268_v60  ;;  %4049 = vmatprep.mubr.bf16.mxu0 %v810_v3  ;;  %v5337_v60 = vld [vmem:[%s7124_s0 + $0x5b4] ss:$8 sps:$4 sm:$0xff]   ;;  %v5341_v3 = vld [vmem:[%s7124_s0 + $0x5c0] ss:$8 sps:$4 sm:$0xff]  }
 0x158   :  { %4019 = vmatprep.subr.bf16.mxu0 %v5280_v0  ;;  %657 = vst [vmem:[#allocation3 + $0x60] sm:$0xf0] %v628_v13  ;;  %v5343_v0 = vld [vmem:[%s7124_s0 + $0x5c4] ss:$8 sps:$4 sm:$0xff]   ;;  %v5425_v56 = vld [vmem:[%s7124_s0 + $0x680] ss:$8 sps:$4 sm:$0xff]  }
 0x159   :  { %3723 = vmatpush1.bf16.msra.mxu1 %v5287_v61  ;;  %v5322_v61 = vld [vmem:[%s7124_s0 + $0xc84] ss:$8 sps:$4 sm:$0xff]   ;;  %v5433_v58 = vld [vmem:[%s7124_s0 + $0x694] ss:$8 sps:$4 sm:$0xff]   ;;  %v5431_v13 = vld [vmem:[%s7124_s0 + $0x690] ss:$8 sps:$4 sm:$0xff]  }
 0x15a   :  { %3724 = vmatprep.subr.bf16.mxu1 %v5295_v62  ;;  %v5335_v62 = vld [vmem:[%s7124_s0 + $0x5b0] ss:$8 sps:$4 sm:$0xff]  }
 0x15b   :  { %4020 = vmatpush1.bf16.msra.mxu0 %v5278_v2  ;;  %v5328_v2 = vld [vmem:[%s7124_s0 + $0xc94] ss:$8 sps:$4 sm:$0xff]  }
 0x15c   :  { %4021 = vmatprep.subr.bf16.mxu0 %v5286_v5  ;;  %v5334_v5 = vld [vmem:[%s7124_s0 + $0xca4] ss:$8 sps:$4 sm:$0xff]  }
 0x15d   :  { %3725 = vmatpush1.bf16.msra.mxu1 %v5293_v30  ;;  %v5326_v30 = vld [vmem:[%s7124_s0 + $0xc90] ss:$8 sps:$4 sm:$0xff]  }
 0x15e   :  { %3726 = vmatprep.subr.bf16.mxu1 %v5301_v4  ;;  %v5349_v4 = vld [vmem:[%s7124_s0 + $0x5d4] ss:$8 sps:$4 sm:$0xff]  }
 0x15f   :  { %4022 = vmatpush1.bf16.msra.mxu0 %v5284_v6  ;;  %v5347_v6 = vld [vmem:[%s7124_s0 + $0x5d0] ss:$8 sps:$4 sm:$0xff]  }
 0x160   :  { %4023 = vmatprep.subr.bf16.mxu0 %v5292_v9  ;;  %v5340_v9 = vld [vmem:[%s7124_s0 + $0xcb4] ss:$8 sps:$4 sm:$0xff]  }
 0x161   :  { %3727 = vmatpush1.bf16.msra.mxu1 %v5299_v7  ;;  %v5332_v7 = vld [vmem:[%s7124_s0 + $0xca0] ss:$8 sps:$4 sm:$0xff]  }
 0x162   :  { %3728 = vmatprep.subr.bf16.mxu1 %v5307_v8  ;;  %v5355_v8 = vld [vmem:[%s7124_s0 + $0x5e4] ss:$8 sps:$4 sm:$0xff]  }
 0x163   :  { %4024 = vmatpush1.bf16.msra.mxu0 %v5290_v10  ;;  %v5353_v10 = vld [vmem:[%s7124_s0 + $0x5e0] ss:$8 sps:$4 sm:$0xff]  }
 0x164   :  { %4025 = vmatprep.subr.bf16.mxu0 %v5298_v14  ;;  %v5346_v14 = vld [vmem:[%s7124_s0 + $0xcc4] ss:$8 sps:$4 sm:$0xff]  }
 0x165   :  { %3729 = vmatpush1.bf16.msra.mxu1 %v5305_v11  ;;  %v5338_v11 = vld [vmem:[%s7124_s0 + $0xcb0] ss:$8 sps:$4 sm:$0xff]  }
 0x166   :  { %3730 = vmatprep.subr.bf16.mxu1 %v5313_v12  ;;  %v5361_v12 = vld [vmem:[%s7124_s0 + $0x5f4] ss:$8 sps:$4 sm:$0xff]  }
 0x167   :  { %4026 = vmatpush1.bf16.msra.mxu0 %v5296_v16  ;;  %v5344_v16 = vld [vmem:[%s7124_s0 + $0xcc0] ss:$8 sps:$4 sm:$0xff]  }
 0x168   :  { %4027 = vmatprep.subr.bf16.mxu0 %v5304_v19  ;;  %v5369_v19 = vld [vmem:[%s7124_s0 + $0x600] ss:$8 sps:$4 sm:$0xff]  }
 0x169   :  { %3731 = vmatpush1.bf16.msra.mxu1 %v5311_v15  ;;  %v5359_v15 = vld [vmem:[%s7124_s0 + $0x5f0] ss:$8 sps:$4 sm:$0xff]  }
 0x16a   :  { %3732 = vmatprep.subr.bf16.mxu1 %v5319_v17  ;;  %v5371_v17 = vld [vmem:[%s7124_s0 + $0x604] ss:$8 sps:$4 sm:$0xff]  }
 0x16b   :  { %4028 = vmatpush1.bf16.msra.mxu0 %v5302_v25  ;;  %v5383_v25 = vld [vmem:[%s7124_s0 + $0x610] ss:$8 sps:$4 sm:$0xff]  }
 0x16c   :  { %4029 = vmatprep.subr.bf16.mxu0 %v5310_v32  ;;  %v5397_v32 = vld [vmem:[%s7124_s0 + $0x634] ss:$8 sps:$4 sm:$0xff]  }
 0x16d   :  { %3733 = vmatpush1.bf16.msra.mxu1 %v5317_v23  ;;  %v798_v23 = vld [vmem:[#allocation3 + $0x68] sm:$0xff] }
 0x16e   :  { %3734 = vmatprep.subr.bf16.mxu1 %v5325_v26  ;;  %v5356_v26 = vld [vmem:[%s7124_s0 + $0xce0] ss:$8 sps:$4 sm:$0xff]  }
 0x16f   :  { %4030 = vmatpush1.bf16.msra.mxu0 %v5308_v42  ;;  %v5409_v42 = vld [vmem:[%s7124_s0 + $0x654] ss:$8 sps:$4 sm:$0xff]  }
 0x170   :  { %4031 = vmatprep.subr.bf16.mxu0 %v5316_v54  ;;  %v5427_v54 = vld [vmem:[%s7124_s0 + $0x684] ss:$8 sps:$4 sm:$0xff]  }
 0x171   :  { %3735 = vmatpush1.bf16.msra.mxu1 %v5323_v40  ;;  %v812_v40 = vld [vmem:[#allocation3 + $0xd8] sm:$0xff] }
 0x172   :  { %3736 = vmatprep.subr.bf16.mxu1 %v5331_v51  ;;  %v5421_v51 = vld [vmem:[%s7124_s0 + $0x674] ss:$8 sps:$4 sm:$0xff]  }
 0x173   :  { %4032 = vmatpush1.bf16.msra.mxu0 %v5314_v59  ;;  %v5416_v59 = vld [vmem:[%s7124_s0 + $0xd60] ss:$8 sps:$4 sm:$0xff]  }
 0x174   :  { %4033 = vmatprep.subr.bf16.mxu0 %v5322_v61  ;;  %v5424_v61 = vld [vmem:[%s7124_s0 + $0xd74] ss:$8 sps:$4 sm:$0xff]  }
 0x175   :  { %3737 = vmatpush1.bf16.msra.mxu1 %v5329_v1  ;;  %v5418_v1 = vld [vmem:[%s7124_s0 + $0xd64] ss:$8 sps:$4 sm:$0xff]  }
 0x176   :  { %3738 = vmatprep.subr.bf16.mxu1 %v5337_v60  ;;  %v5439_v60 = vld [vmem:[%s7124_s0 + $0x6a4] ss:$8 sps:$4 sm:$0xff]  }
 0x177   :  { %4034 = vmatpush1.bf16.msra.mxu0 %v5320_v63  ;;  %v5422_v63 = vld [vmem:[%s7124_s0 + $0xd70] ss:$8 sps:$4 sm:$0xff]  }
 0x178   :  { %4035 = vmatprep.subr.bf16.mxu0 %v5328_v2  ;;  %v5430_v2 = vld [vmem:[%s7124_s0 + $0xd84] ss:$8 sps:$4 sm:$0xff]  }
 0x179   :  { %3739 = vmatpush1.bf16.msra.mxu1 %v5335_v62  ;;  %v5437_v62 = vld [vmem:[%s7124_s0 + $0x6a0] ss:$8 sps:$4 sm:$0xff]  }
 0x17a   :  { %3740 = vmatprep.subr.bf16.mxu1 %v5343_v0  ;;  %v5445_v0 = vld [vmem:[%s7124_s0 + $0x6b4] ss:$8 sps:$4 sm:$0xff]  }
 0x17b   :  { %4036 = vmatpush1.bf16.msra.mxu0 %v5326_v30  ;;  %v5428_v30 = vld [vmem:[%s7124_s0 + $0xd80] ss:$8 sps:$4 sm:$0xff]  }
 0x17c   :  { %4037 = vmatprep.subr.bf16.mxu0 %v5334_v5  ;;  %v5436_v5 = vld [vmem:[%s7124_s0 + $0xd94] ss:$8 sps:$4 sm:$0xff]  }
 0x17d   :  { %3741 = vmatpush1.bf16.msra.mxu1 %v5341_v3  ;;  %v5443_v3 = vld [vmem:[%s7124_s0 + $0x6b0] ss:$8 sps:$4 sm:$0xff]  }
 0x17e   :  { %3742 = vmatprep.subr.bf16.mxu1 %v5349_v4  ;;  %v5451_v4 = vld [vmem:[%s7124_s0 + $0x6c4] ss:$8 sps:$4 sm:$0xff]  }
 0x17f   :  { %4038 = vmatpush1.bf16.msra.mxu0 %v5332_v7  ;;  %v5434_v7 = vld [vmem:[%s7124_s0 + $0xd90] ss:$8 sps:$4 sm:$0xff]  }
 0x180   :  { %4039 = vmatprep.subr.bf16.mxu0 %v5340_v9  ;;  %v5442_v9 = vld [vmem:[%s7124_s0 + $0xda4] ss:$8 sps:$4 sm:$0xff]  }
 0x181   :  { %3743 = vmatpush1.bf16.msra.mxu1 %v5347_v6  ;;  %v5449_v6 = vld [vmem:[%s7124_s0 + $0x6c0] ss:$8 sps:$4 sm:$0xff]  }
 0x182   :  { %3744 = vmatprep.subr.bf16.mxu1 %v5355_v8  ;;  %v5457_v8 = vld [vmem:[%s7124_s0 + $0x6d4] ss:$8 sps:$4 sm:$0xff]  }
 0x183   :  { %4040 = vmatpush1.bf16.msra.mxu0 %v5338_v11  ;;  %v5440_v11 = vld [vmem:[%s7124_s0 + $0xda0] ss:$8 sps:$4 sm:$0xff]  }
 0x184   :  { %4041 = vmatprep.subr.bf16.mxu0 %v5346_v14  ;;  %v5448_v14 = vld [vmem:[%s7124_s0 + $0xdb4] ss:$8 sps:$4 sm:$0xff]  }
 0x185   :  { %3745 = vmatpush1.bf16.msra.mxu1 %v5353_v10  ;;  %v5455_v10 = vld [vmem:[%s7124_s0 + $0x6d0] ss:$8 sps:$4 sm:$0xff]  }
 0x186   :  { %3746 = vmatprep.subr.bf16.mxu1 %v5361_v12  ;;  %v5463_v12 = vld [vmem:[%s7124_s0 + $0x6e4] ss:$8 sps:$4 sm:$0xff]  }
 0x187   :  { %4042 = vmatpush1.bf16.msra.mxu0 %v5344_v16  ;;  %v5446_v16 = vld [vmem:[%s7124_s0 + $0xdb0] ss:$8 sps:$4 sm:$0xff]  }
 0x188   :  { %4043 = vmatprep.subr.bf16.mxu0 %v5352_v18  ;;  %v5454_v18 = vld [vmem:[%s7124_s0 + $0xdc4] ss:$8 sps:$4 sm:$0xff]  }
 0x189   :  { %3747 = vmatpush1.bf16.msra.mxu1 %v5359_v15  ;;  %v5461_v15 = vld [vmem:[%s7124_s0 + $0x6e0] ss:$8 sps:$4 sm:$0xff]  }
 0x18a   :  { %3759 = vmatprep.subr.bf16.mxu1 %v5371_v17  ;;  %v5469_v17 = vld [vmem:[%s7124_s0 + $0x6f4] ss:$8 sps:$4 sm:$0xff]  }
 0x18b   :  { %4044 = vmatpush1.bf16.msra.mxu0 %v5350_v21  ;;  %v5460_v21 = vld [vmem:[%s7124_s0 + $0xdd4] ss:$8 sps:$4 sm:$0xff]  }
 0x18c   :  { %3749 = vmatmul.mubr.bf16.vlgmr.msra.gmra.mrb[0].mxu1 %v795_v20  ;;  %4045 = vmatprep.subr.bf16.mxu0 %v5358_v24  ;;  %v5452_v20 = vld [vmem:[%s7124_s0 + $0xdc0] ss:$8 sps:$4 sm:$0xff]   ;;  %v5466_v24 = vld [vmem:[%s7124_s0 + $0xde4] ss:$8 sps:$4 sm:$0xff]  }
 0x18d   :  { %3760 = vmatpush1.bf16.msra.mxu1 %v5369_v19  ;;  %3791 = vmatprep.mubr.bf16.mxu1 %v798_v23  ;;  %v5467_v19 = vld [vmem:[%s7124_s0 + $0x6f0] ss:$8 sps:$4 sm:$0xff]  }
 0x18e   :  { %3761 = vmatprep.subr.bf16.mxu1 %v5385_v22  ;;  %v797_v22 = vld [vmem:[#allocation3 + $0x60] sm:$0xff]  ;;  %v5458_v23 = vld [vmem:[%s7124_s0 + $0xdd0] ss:$8 sps:$4 sm:$0xff]  }
 0x18f   :  { %4046 = vmatpush1.bf16.msra.mxu0 %v5356_v26  ;;  %v5472_v26 = vld [vmem:[%s7124_s0 + $0xdf4] ss:$8 sps:$4 sm:$0xff]  }
 0x190   :  { %4047 = vmatprep.subr.bf16.mxu0 %v5364_v28  ;;  %v811_v28 = vld [vmem:[#allocation3 + $0xd0] sm:$0xff] }
 0x191   :  { %3762 = vmatpush1.bf16.msra.mxu1 %v5383_v25  ;;  %v5464_v25 = vld [vmem:[%s7124_s0 + $0xde0] ss:$8 sps:$4 sm:$0xff]  }
 0x192   :  { %3763 = vmatprep.subr.bf16.mxu1 %v5391_v27  ;;  %v5470_v27 = vld [vmem:[%s7124_s0 + $0xdf0] ss:$8 sps:$4 sm:$0xff]  }
 0x193   :  { %4048 = vmatpush1.bf16.msra.mxu0 %v5362_v31 }
 0x194   :  { %4060 = vmatprep.subr.bf16.mxu0 %v5378_v33 }
 0x195   :  { %3764 = vmatpush1.bf16.msra.mxu1 %v5389_v29 }
 0x196   :  { %3765 = vmatprep.subr.bf16.mxu1 %v5397_v32  ;;  %4050 = vmatmul.mubr.bf16.vlgmr.msra.gmra.mrb[0].mxu0 %v809_v36 }
 0x197   :  { %4061 = vmatpush1.bf16.msra.mxu0 %v5376_v35  ;;  %4092 = vmatprep.mubr.bf16.mxu0 %v812_v40 }
 0x198   :  { %4062 = vmatprep.subr.bf16.mxu0 %v5388_v37 }
 0x199   :  { %3766 = vmatpush1.bf16.msra.mxu1 %v5395_v34 }
 0x19a   :  { %3767 = vmatprep.subr.bf16.mxu1 %v5403_v38 }
 0x19b   :  { %4063 = vmatpush1.bf16.msra.mxu0 %v5386_v41 }
 0x19c   :  { %4064 = vmatprep.subr.bf16.mxu0 %v5394_v43 }
 0x19d   :  { %3768 = vmatpush1.bf16.msra.mxu1 %v5401_v39 }
 0x19e   :  { %3769 = vmatprep.subr.bf16.mxu1 %v5409_v42 }
 0x19f   :  { %4065 = vmatpush1.bf16.msra.mxu0 %v5392_v45 }
 0x1a0   :  { %4066 = vmatprep.subr.bf16.mxu0 %v5400_v47 }
 0x1a1   :  { %3770 = vmatpush1.bf16.msra.mxu1 %v5407_v44 }
 0x1a2   :  { %3771 = vmatprep.subr.bf16.mxu1 %v5415_v46 }
 0x1a3   :  { %4067 = vmatpush1.bf16.msra.mxu0 %v5398_v50 }
 0x1a4   :  { %4068 = vmatprep.subr.bf16.mxu0 %v5406_v52 }
 0x1a5   :  { %3772 = vmatpush1.bf16.msra.mxu1 %v5413_v49 }
 0x1a6   :  { %3773 = vmatprep.subr.bf16.mxu1 %v5421_v51 }
 0x1a7   :  { %4069 = vmatpush1.bf16.msra.mxu0 %v5404_v48 }
 0x1a8   :  { %4070 = vmatprep.subr.bf16.mxu0 %v5412_v55 }
 0x1a9   :  { %3774 = vmatpush1.bf16.msra.mxu1 %v5419_v53 }
 0x1aa   :  { %3775 = vmatprep.subr.bf16.mxu1 %v5427_v54 }
 0x1ab   :  { %4071 = vmatpush1.bf16.msra.mxu0 %v5410_v57 }
 0x1ac   :  { %4072 = vmatprep.subr.bf16.mxu0 %v5418_v1 }
 0x1ad   :  { %3776 = vmatpush1.bf16.msra.mxu1 %v5425_v56 }
 0x1ae   :  { %3777 = vmatprep.subr.bf16.mxu1 %v5433_v58 }
 0x1af   :  { %4073 = vmatpush1.bf16.msra.mxu0 %v5416_v59 }
 0x1b0   :  { %4074 = vmatprep.subr.bf16.mxu0 %v5424_v61 }
 0x1b1   :  { %3778 = vmatpush1.bf16.msra.mxu1 %v5431_v13  ;;  %v5501_v13 = vld [vmem:[%s7125_s1] sm:$0xff] }
 0x1b2   :  { %3779 = vmatprep.subr.bf16.mxu1 %v5439_v60  ;;  %v5502_v60 = vld [vmem:[%s7125_s1 + $0x10] sm:$0xff] }
 0x1b3   :  { %4075 = vmatpush1.bf16.msra.mxu0 %v5422_v63 }
 0x1b4   :  { %4076 = vmatprep.subr.bf16.mxu0 %v5430_v2 }
 0x1b5   :  { %3780 = vmatpush1.bf16.msra.mxu1 %v5437_v62  ;;  %v5503_v62 = vld [vmem:[%s7125_s1 + $0x20] sm:$0xff] }
 0x1b6   :  { %3781 = vmatprep.subr.bf16.mxu1 %v5445_v0  ;;  %v5504_v0 = vld [vmem:[%s7125_s1 + $0x30] sm:$0xff] }
 0x1b7   :  { %4077 = vmatpush1.bf16.msra.mxu0 %v5428_v30  ;;  %v5505_v30 = vld [vmem:[%s7125_s1 + $0x8] sm:$0xff] }
 0x1b8   :  { %4078 = vmatprep.subr.bf16.mxu0 %v5436_v5  ;;  %v5506_v5 = vld [vmem:[%s7125_s1 + $0x18] sm:$0xff] }
 0x1b9   :  { %3782 = vmatpush1.bf16.msra.mxu1 %v5443_v3 }
 0x1ba   :  { %3783 = vmatprep.subr.bf16.mxu1 %v5451_v4 }
 0x1bb   :  { %4079 = vmatpush1.bf16.msra.mxu0 %v5434_v7  ;;  %v5507_v7 = vld [vmem:[%s7125_s1 + $0x28] sm:$0xff] }
 0x1bc   :  { %4080 = vmatprep.subr.bf16.mxu0 %v5442_v9  ;;  %v5508_v9 = vld [vmem:[%s7125_s1 + $0x38] sm:$0xff] }
 0x1bd   :  { %3784 = vmatpush1.bf16.msra.mxu1 %v5449_v6 }
 0x1be   :  { %3785 = vmatprep.subr.bf16.mxu1 %v5457_v8 }
 0x1bf   :  { %4081 = vmatpush1.bf16.msra.mxu0 %v5440_v11 }
 0x1c0   :  { %4082 = vmatprep.subr.bf16.mxu0 %v5448_v14 }
 0x1c1   :  { %3786 = vmatpush1.bf16.msra.mxu1 %v5455_v10 }
 0x1c2   :  { %3787 = vmatprep.subr.bf16.mxu1 %v5463_v12  ;;  %v5509_v12 = vld [vmem:[%s7125_s1 + $0x40] sm:$0xff] }
 0x1c3   :  { %4083 = vmatpush1.bf16.msra.mxu0 %v5446_v16 }
 0x1c4   :  { %4084 = vmatprep.subr.bf16.mxu0 %v5454_v18 }
 0x1c5   :  { %3788 = vmatpush1.bf16.msra.mxu1 %v5461_v15  ;;  %v5510_v15 = vld [vmem:[%s7125_s1 + $0x50] sm:$0xff] }
 0x1c6   :  { %3789 = vmatprep.subr.bf16.mxu1 %v5469_v17  ;;  %v5511_v17 = vld [vmem:[%s7125_s1 + $0x60] sm:$0xff] }
 0x1c7   :  { %4085 = vmatpush1.bf16.msra.mxu0 %v5452_v20 }
 0x1c8   :  { %4086 = vmatprep.subr.bf16.mxu0 %v5460_v21  ;;  %v5513_v21 = vld [vmem:[%s7125_s1 + $0x48] sm:$0xff] }
 0x1c9   :  { %3790 = vmatpush1.bf16.msra.mxu1 %v5467_v19  ;;  %v5512_v19 = vld [vmem:[%s7125_s1 + $0x70] sm:$0xff] }
 0x1cb   :  { %4087 = vmatpush1.bf16.msra.mxu0 %v5458_v23  ;;  %v5514_v23 = vld [vmem:[%s7125_s1 + $0x58] sm:$0xff] }
 0x1cc   :  { %3792 = vmatmul.mubr.bf16.vlgmr.msra.gmra.mrb[0].mxu1 %v797_v22  ;;  %4088 = vmatprep.subr.bf16.mxu0 %v5466_v24 }
 0x1cf   :  { %4089 = vmatpush1.bf16.msra.mxu0 %v5464_v25  ;;  %v5515_v25 = vld [vmem:[%s7125_s1 + $0x68] sm:$0xff] }
 0x1d0   :  { %4090 = vmatprep.subr.bf16.mxu0 %v5472_v26 }
 0x1d3   :  { %4091 = vmatpush1.bf16.msra.mxu0 %v5470_v27  ;;  %v5516_v27 = vld [vmem:[%s7125_s1 + $0x78] sm:$0xff] }
 0x1d6   :  { %4093 = vmatmul.mubr.bf16.vlgmr.msra.gmra.mrb[0].mxu0 %v811_v28 }
 0x29f   :  { %v3793_v29 = vpop.f32.mrb[0].mxu1 }
 0x2a0   :  { %v3795_v31 = vpop.f32.mrb[1].mxu1 }
 0x2a1   :  { %v3797_v32 = vpop.f32.mrb[2].mxu1 }
 0x2a2   :  { %v3799_v33 = vpop.f32.mrb[3].mxu1 }
 0x2a9   :  { %v4094_v34 = vpop.f32.mrb[0].mxu0 }
 0x2aa   :  { %v4683_v35 = vadd.f32 %v4094_v34, %v3793_v29  ;;  %v4096_v36 = vpop.f32.mrb[1].mxu0 }
 0x2ab   :  { %v4684_v38 = vadd.f32 %v4096_v36, %v3795_v31  ;;  %v4098_v37 = vpop.f32.mrb[2].mxu0 }
 0x2ac   :  { %v4103_v40 = vmax.f32 %v4683_v35, 0.0  ;;  %v4685_v39 = vadd.f32 %v4098_v37, %v3797_v32  ;;  %v4100_v41 = vpop.f32.mrb[3].mxu0 }
 0x2ad   :  { %v4104_v42 = vmax.f32 %v4684_v38, 0.0  ;;  %v4686_v43 = vadd.f32 %v4100_v41, %v3799_v33 }
 0x2ae   :  { %v4675_v44 = vmul.f32 -1.442695, %v4103_v40  ;;  %v4105_v45 = vmax.f32 %v4685_v39, 0.0 }
 0x2af   :  { %v4676_v46 = vmul.f32 -1.442695, %v4104_v42  ;;  %v4106_v47 = vmax.f32 %v4686_v43, 0.0 }
 0x2b0   :  { %5485 = vpow2.f32 %v4675_v44  ;;  %v4677_v49 = vmul.f32 -1.442695, %v4105_v45 }
 0x2b1   :  { %5487 = vpow2.f32 %v4676_v46  ;;  %v4678_v50 = vmul.f32 -1.442695, %v4106_v47 }
 0x2b2   :  { %5489 = vpow2.f32 %v4677_v49 }
 0x2b3   :  { %5491 = vpow2.f32 %v4678_v50 }
 0x2ba   :  { %v5486_v51 = vpop.eup %5485 }
 0x2bb   :  { %v5488_v52 = vpop.eup %5487  ;;  %v4119_v53 = vadd.f32 1.0, %v5486_v51 }
 0x2bc   :  { %v5490_v48 = vpop.eup %5489  ;;  %v4120_v54 = vadd.f32 1.0, %v5488_v52 }
 0x2bd   :  { %v5492_v55 = vpop.eup %5491  ;;  %5493 = vrcp.f32 %v4119_v53  ;;  %v4121_v56 = vadd.f32 1.0, %v5490_v48 }
 0x2be   :  { %5495 = vrcp.f32 %v4120_v54  ;;  %v4122_v57 = vadd.f32 1.0, %v5492_v55 }
 0x2bf   :  { %5497 = vrcp.f32 %v4121_v56 }
 0x2c0   :  { %5499 = vrcp.f32 %v4122_v57 }
 0x2c7   :  { %v5494_v58 = vpop.eup %5493 }
 0x2c8   :  { %v5496_v1 = vpop.eup %5495  ;;  %v4131_v59 = vmul.f32 %v5501_v13, %v5494_v58  ;;  %v4133_v61 = vmul.f32 %v5502_v60, %v5494_v58  ;;  %v4135_v63 = vmul.f32 %v5503_v62, %v5494_v58  ;;  %v4137_v2 = vmul.f32 %v5504_v0, %v5494_v58 }
 0x2c9   :  { %v5498_v3 = vpop.eup %5497  ;;  %v4132_v4 = vmul.f32 %v5505_v30, %v5496_v1  ;;  %v4134_v6 = vmul.f32 %v5506_v5, %v5496_v1  ;;  %v4136_v8 = vmul.f32 %v5507_v7, %v5496_v1  ;;  %v4138_v10 = vmul.f32 %v5508_v9, %v5496_v1 }
 0x2ca   :  { %v5500_v11 = vpop.eup %5499  ;;  %4147 = vst [vmem:[%s7126_s2] sm:$0xff] %v4131_v59  ;;  %4149 = vst [vmem:[%s7126_s2 + $0x10] sm:$0xff] %v4133_v61  ;;  %v4139_v14 = vmul.f32 %v5509_v12, %v5498_v3  ;;  %v4141_v16 = vmul.f32 %v5510_v15, %v5498_v3  ;;  %v4143_v18 = vmul.f32 %v5511_v17, %v5498_v3 }
 0x2cb   :  { %4151 = vst [vmem:[%s7126_s2 + $0x20] sm:$0xff] %v4135_v63  ;;  %4153 = vst [vmem:[%s7126_s2 + $0x30] sm:$0xff] %v4137_v2  ;;  %v4145_v20 = vmul.f32 %v5512_v19, %v5498_v3  ;;  %v4140_v22 = vmul.f32 %v5513_v21, %v5500_v11  ;;  %v4142_v24 = vmul.f32 %v5514_v23, %v5500_v11 }
 0x2cc   :  { %4148 = vst [vmem:[%s7126_s2 + $0x8] sm:$0xff] %v4132_v4  ;;  %4150 = vst [vmem:[%s7126_s2 + $0x18] sm:$0xff] %v4134_v6  ;;  %v4144_v26 = vmul.f32 %v5515_v25, %v5500_v11  ;;  %v4146_v28 = vmul.f32 %v5516_v27, %v5500_v11 }
 0x2cd   :  { %4152 = vst [vmem:[%s7126_s2 + $0x28] sm:$0xff] %v4136_v8  ;;  %4154 = vst [vmem:[%s7126_s2 + $0x38] sm:$0xff] %v4138_v10 }
 0x2ce   :  { %4155 = vst [vmem:[%s7126_s2 + $0x40] sm:$0xff] %v4139_v14  ;;  %4157 = vst [vmem:[%s7126_s2 + $0x50] sm:$0xff] %v4141_v16 }
 0x2cf   :  { %4159 = vst [vmem:[%s7126_s2 + $0x60] sm:$0xff] %v4143_v18  ;;  %4161 = vst [vmem:[%s7126_s2 + $0x70] sm:$0xff] %v4145_v20 }
 0x2d0   :  { %4156 = vst [vmem:[%s7126_s2 + $0x48] sm:$0xff] %v4140_v22  ;;  %4158 = vst [vmem:[%s7126_s2 + $0x58] sm:$0xff] %v4142_v24 }
 0x2d1   :  { %4160 = vst [vmem:[%s7126_s2 + $0x68] sm:$0xff] %v4144_v26  ;;  %4162 = vst [vmem:[%s7126_s2 + $0x78] sm:$0xff] %v4146_v28 }

</bundles_post_ra>
